<compile_context>
chip_gen: v5e
topology: v5e:2x2
jax: 0.10.0
libtpu: 0.0.40
codegen_flags: <defaults>
</compile_context>

<pallas_src>
import functools

import jax
import jax.numpy as jnp
from jax.experimental import pallas as pl
from jax.experimental.pallas import tpu as pltpu


# --------------------------------------------------------------------------- #
# Fused attention kernel: one (batch, head) pair per grid step.
# --------------------------------------------------------------------------- #
def _attention_kernel(x_ref, wqkv_ref, wp_ref, bp_ref,
                      o_ref, acc_ref, *, scale, head_dim):
    h = pl.program_id(1)

    @pl.when(h == 0)
    def _init():
        acc_ref[...] = jnp.zeros_like(acc_ref)

    x = x_ref[0]                                                     # (N, C)

    # Per-head QKV projection in one wide MXU matmul: (N, C) @ (C, 3D).
    qkv = jnp.dot(x, wqkv_ref[...], preferred_element_type=jnp.float32)
    # Static, 128-aligned slices of the (N, 3D) result.
    q = qkv[:, :head_dim] * scale            # scale folded into q (as in torch)
    k = qkv[:, head_dim:2 * head_dim]
    v = qkv[:, 2 * head_dim:]

    # Scores q @ k^T (contract on head_dim) without materializing a transpose.
    s = jax.lax.dot_general(q, k, (((1,), (1,)), ((), ())),
                            preferred_element_type=jnp.float32)      # (N, N)

    # Numerically stable softmax over the key axis.
    s = s - jnp.max(s, axis=-1, keepdims=True)
    p = jnp.exp(s)
    p = p / jnp.sum(p, axis=-1, keepdims=True)
    # attn_drop / proj_drop have p=0.0 (identity) -> omitted.

    o = jnp.dot(p, v, preferred_element_type=jnp.float32)            # (N, D)

    # Accumulate this head's slice of the output projection (reduction over h).
    acc_ref[...] += jnp.dot(o, wp_ref[...],
                            preferred_element_type=jnp.float32)      # (N, C)

    @pl.when(h == pl.num_programs(1) - 1)
    def _finalize():
        o_ref[0] = (acc_ref[...] + bp_ref[...]).astype(o_ref.dtype)


# --------------------------------------------------------------------------- #
# Wrapper: weight layout (contraction dim leading, per-head [q|k|v] columns
# made contiguous on lanes) + pallas_call.
# --------------------------------------------------------------------------- #
def attention_forward(x, qkv_weight, proj_weight, proj_bias, *,
                      num_heads, qk_scale=None):
    """x: (B, N, C); qkv_weight: (3*AHD, C); proj_weight: (C, AHD); proj_bias: (C,)."""
    B, N, C = x.shape
    AHD = qkv_weight.shape[0] // 3
    D = AHD // num_heads
    H = num_heads
    scale = qk_scale if qk_scale is not None else D ** (-0.5)

    # (C, 3*AHD) with column order [q_all_heads | k_all_heads | v_all_heads];
    # regroup so head h owns the contiguous 3*D column block [q_h | k_h | v_h].
    wqkv_t = jnp.transpose(qkv_weight)                         # (C, 3*H*D)
    wqkv_heads = (wqkv_t.reshape(C, 3, H, D)
                  .transpose(0, 2, 1, 3)
                  .reshape(C, H * 3 * D))                      # (C, H*3*D)
    wproj_t = jnp.transpose(proj_weight)                       # (AHD, C)
    bproj = proj_bias.reshape(1, C)

    kernel = functools.partial(_attention_kernel, scale=scale, head_dim=D)
    return pl.pallas_call(
        kernel,
        out_shape=jax.ShapeDtypeStruct((B, N, C), x.dtype),
        grid_spec=pltpu.PrefetchScalarGridSpec(
            num_scalar_prefetch=0,
            grid=(B, H),
            in_specs=[
                pl.BlockSpec((1, N, C), lambda b, h: (b, 0, 0)),   # x, resident over h
                pl.BlockSpec((C, 3 * D), lambda b, h: (0, h)),     # [Wq|Wk|Wv] head h
                pl.BlockSpec((D, C), lambda b, h: (h, 0)),         # Wproj rows head h
                pl.BlockSpec((1, C), lambda b, h: (0, 0)),         # proj bias
            ],
            out_specs=pl.BlockSpec((1, N, C), lambda b, h: (b, 0, 0)),
            scratch_shapes=[pltpu.VMEM((N, C), jnp.float32)],
        ),
        compiler_params=pltpu.CompilerParams(
            dimension_semantics=("parallel", "arbitrary")),
    )(x, wqkv_heads, wproj_t, bproj)


# --------------------------------------------------------------------------- #
# Pure-JAX reference (mirrors the PyTorch forward with default flags).
# --------------------------------------------------------------------------- #
def reference_forward(x, qkv_weight, proj_weight, proj_bias, *,
                      num_heads, qk_scale=None):
    B, N, C = x.shape
    AHD = qkv_weight.shape[0] // 3
    D = AHD // num_heads
    scale = qk_scale if qk_scale is not None else D ** (-0.5)

    qkv = x @ qkv_weight.T                          # qkv_bias=False -> no bias
    qkv = qkv.reshape(B, N, 3, num_heads, D)
    qkv = jnp.transpose(qkv, (2, 0, 3, 1, 4))       # (3, B, H, N, D)
    q, k, v = qkv[0] * scale, qkv[1], qkv[2]
    attn = jnp.einsum("bhqd,bhkd->bhqk", q, k)
    attn = jax.nn.softmax(attn, axis=-1)
    out = jnp.einsum("bhqk,bhkd->bhqd", attn, v)
    out = jnp.transpose(out, (0, 2, 1, 3)).reshape(B, N, AHD)
    return out @ proj_weight.T + proj_bias


if __name__ == "__main__":
    key = jax.random.PRNGKey(0)
    kx, kqkv, kproj, kb = jax.random.split(key, 4)

    # Module config: dim=256, num_heads=2 -> head_dim=128 (lane-aligned),
    # attn_head_dim=None, qkv_bias=False, attn_drop=proj_drop=0.0 (defaults).
    B, N, C = 2, 128, 256
    H = 2
    AHD = C

    x = jax.random.normal(kx, (B, N, C), dtype=jnp.float32)
    qkv_weight = jax.random.normal(kqkv, (3 * AHD, C), dtype=jnp.float32) * (C ** -0.5)
    proj_weight = jax.random.normal(kproj, (C, AHD), dtype=jnp.float32) * (AHD ** -0.5)
    proj_bias = jax.random.normal(kb, (C,), dtype=jnp.float32) * 0.02

    out = jax.block_until_ready(
        attention_forward(x, qkv_weight, proj_weight, proj_bias, num_heads=H))
    assert out.shape == (B, N, C), out.shape

    ref = reference_forward(x, qkv_weight, proj_weight, proj_bias, num_heads=H)
    max_err = float(jnp.max(jnp.abs(out - ref)))
    assert jnp.allclose(out, ref, rtol=1e-3, atol=1e-3), max_err

    print("KERNEL_OK")
</pallas_src>

<mosaic_0001>
module attributes {stable_mosaic.version = 11 : i64} {
  func.func @_attention_kernel(%arg0: i32, %arg1: i32, %arg2: memref<1x128x256xf32, #tpu.memory_space<vmem>>, %arg3: memref<256x384xf32, #tpu.memory_space<vmem>>, %arg4: memref<128x256xf32, #tpu.memory_space<vmem>>, %arg5: memref<1x256xf32, #tpu.memory_space<vmem>>, %arg6: memref<1x128x256xf32, #tpu.memory_space<vmem>>, %arg7: memref<128x256xf32, #tpu.memory_space<vmem>>) attributes {dimension_semantics = [#tpu.dimension_semantics<parallel>, #tpu.dimension_semantics<arbitrary>], iteration_bounds = array<i64: 2, 2>, scalar_prefetch = 0 : i64, scratch_operands = 1 : i64, tpu.core_type = #tpu.core_type<tc>, window_params = [{transform_indices = @transform_0, window_bounds = array<i64: 1, 128, 256>}, {transform_indices = @transform_1, window_bounds = array<i64: 256, 384>}, {transform_indices = @transform_2, window_bounds = array<i64: 128, 256>}, {pipeline_mode = #tpu.pipeline_mode<synchronous>, transform_indices = @transform_3, window_bounds = array<i64: 1, 256>}, {transform_indices = @transform_4, window_bounds = array<i64: 1, 128, 256>}]} {
    %c0_i32 = arith.constant 0 : i32
    %0 = arith.cmpi eq, %arg1, %c0_i32 : i32
    %1 = arith.extui %0 : i1 to i32
    %c0_i32_0 = arith.constant 0 : i32
    %2 = arith.cmpi ne, %1, %c0_i32_0 : i32
    scf.if %2 {
      %cst_18 = arith.constant 0.000000e+00 : f32
      %31 = vector.broadcast %cst_18 : f32 to vector<128x256xf32>
      %c0_19 = arith.constant 0 : index
      %c0_20 = arith.constant 0 : index
      %32 = vector.load %arg7[%c0_19, %c0_20] : memref<128x256xf32, #tpu.memory_space<vmem>>, vector<128x256xf32>
      tpu.vector_store %arg7[%c0_19, %c0_20], %31 {strides = array<i32>} : memref<128x256xf32, #tpu.memory_space<vmem>>, vector<128x256xf32>,
    } else {
    }
    %c0 = arith.constant 0 : index
    %c0_1 = arith.constant 0 : index
    %c0_2 = arith.constant 0 : index
    %3 = vector.load %arg2[%c0, %c0_1, %c0_2] : memref<1x128x256xf32, #tpu.memory_space<vmem>>, vector<1x128x256xf32>
    %4 = vector.shape_cast %3 : vector<1x128x256xf32> to vector<128x256xf32>
    %c0_3 = arith.constant 0 : index
    %c0_4 = arith.constant 0 : index
    %5 = vector.load %arg3[%c0_3, %c0_4] : memref<256x384xf32, #tpu.memory_space<vmem>>, vector<256x384xf32>
    %cst = arith.constant dense<0.000000e+00> : vector<128x384xf32>
    %6 = tpu.matmul %4, %5, %cst {dimension_numbers = #tpu.dot_dimension_numbers<[1], [0], [0], [1], [0, 0, 1, 1], [], []>} : vector<128x256xf32>, vector<256x384xf32>, vector<128x384xf32> -> vector<128x384xf32>
    %7 = vector.extract_strided_slice %6 {offsets = [0, 0], sizes = [128, 128], strides = [1, 1]} : vector<128x384xf32> to vector<128x128xf32>
    %cst_5 = arith.constant 0.0883883461 : f32
    %8 = vector.broadcast %cst_5 : f32 to vector<128x128xf32>
    %9 = arith.mulf %7, %8 : vector<128x128xf32>
    %10 = vector.extract_strided_slice %6 {offsets = [0, 128], sizes = [128, 128], strides = [1, 1]} : vector<128x384xf32> to vector<128x128xf32>
    %11 = vector.extract_strided_slice %6 {offsets = [0, 256], sizes = [128, 128], strides = [1, 1]} : vector<128x384xf32> to vector<128x128xf32>
    %cst_6 = arith.constant dense<0.000000e+00> : vector<128x128xf32>
    %12 = tpu.matmul %9, %10, %cst_6 {dimension_numbers = #tpu.dot_dimension_numbers<[1], [1], [0], [0], [0, 0, 1, 0], [], []>} : vector<128x128xf32>, vector<128x128xf32>, vector<128x128xf32> -> vector<128x128xf32>
    %cst_7 = arith.constant dense<0xFF800000> : vector<128xf32>
    %13 = vector.multi_reduction <maximumf>, %12, %cst_7 [1] : vector<128x128xf32> to vector<128xf32>
    %14 = vector.shape_cast %13 : vector<128xf32> to vector<128x1xf32>
    %15 = vector.broadcast %14 : vector<128x1xf32> to vector<128x128xf32>
    %16 = arith.subf %12, %15 : vector<128x128xf32>
    %17 = math.exp %16 : vector<128x128xf32>
    %cst_8 = arith.constant dense<0.000000e+00> : vector<128xf32>
    %18 = vector.multi_reduction <add>, %17, %cst_8 [1] : vector<128x128xf32> to vector<128xf32>
    %19 = vector.shape_cast %18 : vector<128xf32> to vector<128x1xf32>
    %20 = vector.broadcast %19 : vector<128x1xf32> to vector<128x128xf32>
    %21 = arith.divf %17, %20 : vector<128x128xf32>
    %cst_9 = arith.constant dense<0.000000e+00> : vector<128x128xf32>
    %22 = tpu.matmul %21, %11, %cst_9 {dimension_numbers = #tpu.dot_dimension_numbers<[1], [0], [0], [1], [0, 0, 1, 1], [], []>} : vector<128x128xf32>, vector<128x128xf32>, vector<128x128xf32> -> vector<128x128xf32>
    %c0_10 = arith.constant 0 : index
    %c0_11 = arith.constant 0 : index
    %23 = vector.load %arg7[%c0_10, %c0_11] : memref<128x256xf32, #tpu.memory_space<vmem>>, vector<128x256xf32>
    %c0_12 = arith.constant 0 : index
    %c0_13 = arith.constant 0 : index
    %24 = vector.load %arg4[%c0_12, %c0_13] : memref<128x256xf32, #tpu.memory_space<vmem>>, vector<128x256xf32>
    %cst_14 = arith.constant dense<0.000000e+00> : vector<128x256xf32>
    %25 = tpu.matmul %22, %24, %cst_14 {dimension_numbers = #tpu.dot_dimension_numbers<[1], [0], [0], [1], [0, 0, 1, 1], [], []>} : vector<128x128xf32>, vector<128x256xf32>, vector<128x256xf32> -> vector<128x256xf32>
    %26 = arith.addf %23, %25 : vector<128x256xf32>
    %c0_15 = arith.constant 0 : index
    %c0_16 = arith.constant 0 : index
    %27 = vector.load %arg7[%c0_15, %c0_16] : memref<128x256xf32, #tpu.memory_space<vmem>>, vector<128x256xf32>
    tpu.vector_store %arg7[%c0_15, %c0_16], %26 {strides = array<i32>} : memref<128x256xf32, #tpu.memory_space<vmem>>, vector<128x256xf32>,
    %c1_i32 = arith.constant 1 : i32
    %28 = arith.cmpi eq, %arg1, %c1_i32 : i32
    %29 = arith.extui %28 : i1 to i32
    %c0_i32_17 = arith.constant 0 : i32
    %30 = arith.cmpi ne, %29, %c0_i32_17 : i32
    scf.if %30 {
      %c0_18 = arith.constant 0 : index
      %c0_19 = arith.constant 0 : index
      %31 = vector.load %arg7[%c0_18, %c0_19] : memref<128x256xf32, #tpu.memory_space<vmem>>, vector<128x256xf32>
      %c0_20 = arith.constant 0 : index
      %c0_21 = arith.constant 0 : index
      %32 = vector.load %arg5[%c0_20, %c0_21] : memref<1x256xf32, #tpu.memory_space<vmem>>, vector<1x256xf32>
      %33 = vector.broadcast %32 : vector<1x256xf32> to vector<128x256xf32>
      %34 = arith.addf %31, %33 : vector<128x256xf32>
      %c0_22 = arith.constant 0 : index
      %c0_23 = arith.constant 0 : index
      %c0_24 = arith.constant 0 : index
      %35 = vector.load %arg6[%c0_22, %c0_23, %c0_24] : memref<1x128x256xf32, #tpu.memory_space<vmem>>, vector<1x128x256xf32>
      %36 = vector.shape_cast %35 : vector<1x128x256xf32> to vector<128x256xf32>
      %37 = vector.shape_cast %34 : vector<128x256xf32> to vector<1x128x256xf32>
      tpu.vector_store %arg6[%c0_22, %c0_23, %c0_24], %37 {strides = array<i32>} : memref<1x128x256xf32, #tpu.memory_space<vmem>>, vector<1x128x256xf32>,
    } else {
    }
    return
  }
  func.func @transform_0(%arg0: i32, %arg1: i32) -> (i32, i32, i32) {
    %c0_i32 = arith.constant 0 : i32
    %c0_i32_0 = arith.constant 0 : i32
    %c0_i32_1 = arith.constant 0 : i32
    return %arg0, %c0_i32, %c0_i32_0 : i32, i32, i32
  }
  func.func @transform_1(%arg0: i32, %arg1: i32) -> (i32, i32) {
    %c0_i32 = arith.constant 0 : i32
    %c0_i32_0 = arith.constant 0 : i32
    return %c0_i32, %arg1 : i32, i32
  }
  func.func @transform_2(%arg0: i32, %arg1: i32) -> (i32, i32) {
    %c0_i32 = arith.constant 0 : i32
    %c0_i32_0 = arith.constant 0 : i32
    return %arg1, %c0_i32 : i32, i32
  }
  func.func @transform_3(%arg0: i32, %arg1: i32) -> (i32, i32) {
    %c0_i32 = arith.constant 0 : i32
    %c0_i32_0 = arith.constant 0 : i32
    %c0_i32_1 = arith.constant 0 : i32
    return %c0_i32, %c0_i32_0 : i32, i32
  }
  func.func @transform_4(%arg0: i32, %arg1: i32) -> (i32, i32, i32) {
    %c0_i32 = arith.constant 0 : i32
    %c0_i32_0 = arith.constant 0 : i32
    %c0_i32_1 = arith.constant 0 : i32
    return %arg0, %c0_i32, %c0_i32_0 : i32, i32, i32
  }
}

</mosaic_0001>

<bundles_post_ra>
// kernel: tpu_custom_call.1
= control target key start
LH: loop header
LB: loop body
LE: loop exit
PB: predicated region body
PF: predicated region fallthrough
CT: control target
= control target key end

     0   :  { %s3302_s0 = inlined_call_operand.hbm [shape: f32[2,128,256], index: 0, kind: input, shape index: {}]   ;;  %s3303_s1 = inlined_call_operand.hbm [shape: f32[256,768], index: 1, kind: input, shape index: {}]   ;;  %s3304_s2 = inlined_call_operand.hbm [shape: f32[256,256], index: 2, kind: input, shape index: {}]   ;;  %s3305_s3 = inlined_call_operand.vmem [shape: f32[1,256], index: 3, kind: input, shape index: {}]   ;;  %s3306_s4 = inlined_call_operand.hbm [shape: f32[2,128,256], index: 4, kind: output, shape index: {}]  }
   0x1   :  { %3325 = sst [smem:[#allocation45_spill]] %s3303_s1 }
   0x2   :  { %3326 = sst [smem:[#allocation46_spill]] %s3305_s3 }
   0x3   :  { %3327 = sst [smem:[#allocation47_spill]] %s3306_s4 }
   0x4   :  { %9 = vsyncpa [#allocation4], 0 }
   0x5   :  { %11 = vsyncpa [#allocation4 + $0x1], 0 }
   0x6   :  { %12 = vsyncpa [#allocation7], 0 }
   0x7   :  { %14 = vsyncpa [#allocation7 + $0x1], 0 }
   0x8   :  { %15 = vsyncpa [#allocation5], 0 }
   0x9   :  { %17 = vsyncpa [#allocation5 + $0x1], 0  ;;  %s2370_s15 = smov 0   ;;  %s2372_s16 = smov 0  }
   0xa   :  { %s2374_s17 = smov 0   ;;  %s2376_s18 = smov 0  }
   0xb   :  { %s2378_s19 = smov 0   ;;  %s2380_s20 = smov 0  }
   0xc   :  { %s2382_s21 = smov 0   ;;  %s2384_s22 = smov 0  }
   0xd   :  { %s2386_s23 = smov 0   ;;  %s2388_s24 = smov 0  }
   0xe   :  { %s2390_s25 = smov 0  }
   0xf LB: > { %3328 = sst [smem:[#allocation13_spill]] %s2307_s18  ;;  %s32_s26 = sadd.s32 1, %s2327_s23  ;;  %s2335_s25 = sphi %s2390_s25, %s23_s25   ;;  %s2331_s24 = sphi %s2388_s24, %s3407_s24   ;;  %s2327_s23 = sphi %s2386_s23, %s3414_s23   ;;  %s2323_s22 = sphi %s2384_s22, %s3405_s22   ;;  %s2319_s21 = sphi %s2382_s21, %s3413_s21   ;;  %s2315_s20 = sphi %s2380_s20, %s3404_s20   ;;  %s2311_s19 = sphi %s2378_s19, %s3412_s19   ;;  %s2307_s18 = sphi %s2376_s18, %s3411_s18   ;;  %s2303_s17 = sphi %s2374_s17, %s3410_s17   ;;  %s2299_s16 = sphi %s2372_s16, %s3409_s16   ;;  %s2295_s15 = sphi %s2370_s15, %s3408_s15  }
  0x10   : > { %3329 = sst [smem:[#allocation14_spill]] %s2315_s20  ;;  %p50_p0 = scmp.eq.s32.totalorder %s2335_s25, 0 }
  0x11   : > { %3330 = sst [smem:[#allocation15_spill]] %s2323_s22  ;;  %p2427_p1 = scmp.ge.s32.totalorder %s32_s26, 2 }
  0x12   : > { %3331 = sst [smem:[#allocation16_spill]] %s2331_s24  ;;  %s68_s28 = sadd.s32 1, %s2303_s17 }
  0x13   : > { %p75_p2 = scmp.ne.s32.totalorder %s2303_s17, %s2299_s16  ;;  %p81_p3 = scmp.ne.s32.totalorder %s2299_s16, %s2295_s15 }
  0x14   : > { %s3416_s26 = smov (%p2427_p1, %s32_s26), 0  ;;  %p1957_p5 = scmp.lt.s32.totalorder %s2335_s25, 4 }
  0x15   : > { %3333 = sst [smem:[#allocation17_spill]] %s3416_s26  ;;  %p77_p4 = por %p75_p2, %p50_p0 }
  0x16   : > { %s65_s29 = ssub.s32 %s2327_s23, %s3416_s26  ;;  %s203_s30 = sand.u32 1, %s2335_s25  }
  0x17   : > { %p66_p6 = scmp.eq.s32.totalorder %s65_s29, 0  ;;  %s3307_s5 = sand.u32 1, %s2303_s17  }
  0x18   : > { %s1933_s7 = smul.u32 768, %s3307_s5  ;;  %p2454_p7 = pnand %p1957_p5, %p77_p4 }
  0x19   : > { %s2448_s6 = scalar_select %p66_p6, %s2303_s17, %s68_s28  }
  0x1a   : > { %s1897_s9 = smul.u32 24, %s2327_s23  ;;  %s3336_s1 = sld [smem:[#allocation45_spill]] }
  0x1b   : > { %3334 = sst [smem:[#allocation18_spill]] %s2448_s6  ;;  %s207_s13 = scalar_lea.vmem [#allocation6], %s1933_s7 }
  0x1c   : > { %s215_s14 = sshll.u32 %s207_s13, 4  ;;  %p1885_p8 = scmp.ge.s32.totalorder %s2335_s25, 1  ;;  %s216_s14 = int_to_ptr.vmem [resolvable:$true] %s215_s14 }
  0x1d   : > { %s2463_s29 = scalar_lea.sflag [#allocation7], %s203_s30  ;;  %s2337_s10 = smov 768  }
  0x1e   : > { %s2339_s11 = smov 24   ;;  %p246_p9 = scmp.lt.s32.totalorder %s2335_s25, 5 }
  0x1f   : > { %s1874_s30 = sadd.s32 4294967294, %s2335_s25   ;;  %s35_s13 = sadd.s32 1, %s2331_s24 }
  0x20   : > { %s212_s12 = scalar_lea.hbm %s3336_s1, %s1897_s9  ;;  %s2338_s9 = smov 384  }
  0x21   : > { %s213_s28 = sshll.u32 %s212_s12, 4  ;;  %p2469_p10 = pnand %p1885_p8, %p246_p9  ;;  %s214_s28 = int_to_ptr.hbm [resolvable:$true] %s213_s28 }
  0x22   : > { %1949 = dma.hbm_to_vmem [thread:$0]  (!%p2454_p7), %s214_s28, 12288, %s216_s14, %s2463_s29, %s2337_s10, %s2338_s9, %s2339_s11  }
  0x23   : > { %s2474_s12 = sadd.s32 4294967295, %s2335_s25   ;;  %s42_s5 = sadd.s32 1, %s2315_s20 }
  0x24   : > { %s3418_s13 = smov (!%p2427_p1, %s35_s13), %s2331_s24  ;;  %p49_p11 = scmp.ne.s32.totalorder %s2315_s20, %s2311_s19 }
  0x25   : > { %p55_p12 = scmp.ne.s32.totalorder %s2311_s19, %s2307_s18  ;;  %p37_p13 = scmp.ge.s32.totalorder %s3418_s13, 2 }
  0x26   : > { %p56_p2 = scmp.eq.s32.totalorder %s2474_s12, 0  ;;  %p2489_p4 = por %p50_p0, %p49_p11 }
  0x27   : > { %p152_p6 = scmp.eq.s32.totalorder %s2474_s12, 3  ;;  %s3420_s13 = smov (%p37_p13, %s3418_s13), 0 }
  0x28   : > { %3339 = sst [smem:[#allocation19_spill]] %s3420_s13  ;;  %p2499_p8 = por %p56_p2, %p55_p12 }
  0x29   : > { %p2506_p1 = por %p81_p3, %p56_p2  ;;  %s39_s10 = ssub.s32 %s2331_s24, %s3420_s13 }
  0x2a   : > { %p2512_p0 = por %p152_p6, %p49_p11  ;;  %p40_p9 = scmp.eq.s32.totalorder %s39_s10, 0 }
  0x2b   : > { %p158_p13 = scmp.eq.s32.totalorder %s1874_s30, 3  ;;  %s181_s11 = sand.u32 1, %s2315_s20  }
  0x2c   : > { %s3342_s9 = scalar_select %p2512_p0, 1, 0 }
  0x2d   : > { %s1896_s1 = sshll.u32 %s2331_s24, 8  ;;  %p2524_p3 = por %p158_p13, %p55_p12 }
  0x2e   : > { %3343 = sst [smem:[#allocation20_spill]] %s3342_s9  ;;  %s1877_s6 = sshll.u32 %s181_s11, 8 }
  0x2f   : > { %s2519_s26 = scalar_select %p40_p9, %s2315_s20, %s42_s5  }
  0x30   : > { %s3345_s15 = scalar_select %p2524_p3, 1, 0 }
  0x31   : > { %3344 = sst [smem:[#allocation21_spill]] %s2519_s26  ;;  %s190_s22 = scalar_lea.hbm %s3302_s0, %s1896_s1 }
  0x32   : > { %3346 = sst [smem:[#allocation22_spill]] %s3345_s15  ;;  %s191_s3 = sshll.u32 %s190_s22, 4  ;;  %s192_s3 = int_to_ptr.hbm [resolvable:$true] %s191_s3 }
  0x33   : > { %s185_s9 = scalar_lea.vmem [#allocation3], %s1877_s6  ;;  %p1944_p11 = pnand %p1957_p5, %p2489_p4 }
  0x34   : > { %s193_s30 = sshll.u32 %s185_s9, 4  ;;  %s3347_s5 = sand.u32 1, %s2303_s17   ;;  %s194_s30 = int_to_ptr.vmem [resolvable:$true] %s193_s30 }
  0x35   : > { %s1881_s10 = sshll.u32 %s3347_s5, 8  ;;  %s182_s24 = scalar_lea.sflag [#allocation4], %s181_s11 }
  0x36   : > { %s2340_s26 = smov 256   ;;  %s2341_s20 = smov 16  }
  0x37   : > { %1946 = dma.hbm_to_vmem [thread:$0]  (!%p1944_p11), %s192_s3, 4096, %s194_s30, %s182_s24, %s2340_s26, %s2340_s26, %s2341_s20  }
  0x38   : > { %s1899_s15 = sshll.u32 %s2327_s23, 8  ;;  %s229_s22 = scalar_lea.vmem [#allocation8], %s1881_s10 }
  0x39   : > { %s235_s1 = scalar_lea.hbm %s3304_s2, %s1899_s15  ;;  %s238_s6 = sshll.u32 %s229_s22, 4  ;;  %s239_s6 = int_to_ptr.vmem [resolvable:$true] %s238_s6 }
  0x3a   : > { %s236_s13 = sshll.u32 %s235_s1, 4  ;;  %250 = sbr.rel (%p2469_p10) target bundleno = 1433 (0x599), region = 36  ;;  %s237_s13 = int_to_ptr.hbm [resolvable:$true] %s236_s13 }
  0x3b   : > { %1952 = dma.hbm_to_vmem [thread:$0]  (!%p2454_p7), %s237_s13, 4096, %s239_s6, %s2463_s29, %s2340_s26, %s2340_s26, %s2341_s20  }
  0x3f   : > { %s2547_s14 = sand.u32 1, %s2311_s19  }
  0x40   : > { %s1886_s3 = sshll.u32 %s2547_s14, 8  ;;  %s253_s24 = scalar_lea.sflag [#allocation4], %s2547_s14 }
  0x41   : > { %s2551_s18 = scalar_lea.vmem [#allocation3], %s1886_s3 }
  0x42   : > { %2282 = dma.done.wait (%p2499_p8), %s253_s24, 4096  }
  0x43   : > { %2284 = vsyncadd (%p2499_p8), %s253_s24, 4294963200  ;;  %s262_s20 = sand.u32 1, %s2474_s12   ;;  %s264_s26 = sand.u32 1, %s2299_s16  }
  0x44   : > { %s1934_s8 = smul.u32 768, %s264_s26  ;;  %s263_s29 = scalar_lea.sflag [#allocation7], %s262_s20 }
  0x46   : > { %s2559_s7 = scalar_lea.vmem [#allocation6], %s1934_s8 }
  0x47   : > { %2286 = dma.done.wait (%p2506_p1), %s263_s29, 16384  }
  0x48   : > { %2288 = vsyncadd (%p2506_p1), %s263_s29, 4294950912  ;;  %s1887_s9 = sshll.u32 %s264_s26, 8  ;;  %s2567_s15 = scalar_lea.vmem [#allocation9], %s1886_s3 }
  0x49   : > { %s2565_s11 = scalar_lea.vmem [#allocation8], %s1887_s9  ;;  %p1889_p5 = scmp.ne.s32.totalorder %s2319_s21, 0 }
  0x4b   : > { %317 = sbr.rel (%p1889_p5) target bundleno = 113 (0x71), region = 52 }
  0x50   : > { %v2342_v0 = vmov 0.0  }
  0x51   : > { %318 = vst [vmem:[#allocation2 + $0xb0] sm:$0xff] %v2342_v0 }
  0x52   : > { %319 = vst [vmem:[#allocation2] sm:$0xff] %v2342_v0 }
  0x53   : > { %320 = vst [vmem:[#allocation2 + $0xd8] sm:$0xff] %v2342_v0 }
  0x54   : > { %321 = vst [vmem:[#allocation2 + $0x18] sm:$0xff] %v2342_v0 }
  0x55   : > { %322 = vst [vmem:[#allocation2 + $0x50] sm:$0xff] %v2342_v0 }
  0x56   : > { %323 = vst [vmem:[#allocation2 + $0x68] sm:$0xff] %v2342_v0 }
  0x57   : > { %324 = vst [vmem:[#allocation2 + $0x30] sm:$0xff] %v2342_v0 }
  0x58   : > { %325 = vst [vmem:[#allocation2 + $0x48] sm:$0xff] %v2342_v0 }
  0x59   : > { %326 = vst [vmem:[#allocation2 + $0x80] sm:$0xff] %v2342_v0 }
  0x5a   : > { %327 = vst [vmem:[#allocation2 + $0x88] sm:$0xff] %v2342_v0 }
  0x5b   : > { %328 = vst [vmem:[#allocation2 + $0xe8] sm:$0xff] %v2342_v0 }
  0x5c   : > { %329 = vst [vmem:[#allocation2 + $0xb8] sm:$0xff] %v2342_v0 }
  0x5d   : > { %330 = vst [vmem:[#allocation2 + $0x60] sm:$0xff] %v2342_v0 }
  0x5e   : > { %331 = vst [vmem:[#allocation2 + $0xf0] sm:$0xff] %v2342_v0 }
  0x5f   : > { %332 = vst [vmem:[#allocation2 + $0x8] sm:$0xff] %v2342_v0 }
  0x60   : > { %333 = vst [vmem:[#allocation2 + $0x78] sm:$0xff] %v2342_v0 }
  0x61   : > { %334 = vst [vmem:[#allocation2 + $0x38] sm:$0xff] %v2342_v0 }
  0x62   : > { %335 = vst [vmem:[#allocation2 + $0x58] sm:$0xff] %v2342_v0 }
  0x63   : > { %336 = vst [vmem:[#allocation2 + $0x40] sm:$0xff] %v2342_v0 }
  0x64   : > { %337 = vst [vmem:[#allocation2 + $0xc8] sm:$0xff] %v2342_v0 }
  0x65   : > { %338 = vst [vmem:[#allocation2 + $0xe0] sm:$0xff] %v2342_v0 }
  0x66   : > { %339 = vst [vmem:[#allocation2 + $0x90] sm:$0xff] %v2342_v0 }
  0x67   : > { %340 = vst [vmem:[#allocation2 + $0x70] sm:$0xff] %v2342_v0 }
  0x68   : > { %341 = vst [vmem:[#allocation2 + $0xc0] sm:$0xff] %v2342_v0 }
  0x69   : > { %342 = vst [vmem:[#allocation2 + $0xa8] sm:$0xff] %v2342_v0 }
  0x6a   : > { %343 = vst [vmem:[#allocation2 + $0xd0] sm:$0xff] %v2342_v0 }
  0x6b   : > { %344 = vst [vmem:[#allocation2 + $0x10] sm:$0xff] %v2342_v0 }
  0x6c   : > { %345 = vst [vmem:[#allocation2 + $0x28] sm:$0xff] %v2342_v0 }
  0x6d   : > { %346 = vst [vmem:[#allocation2 + $0xa0] sm:$0xff] %v2342_v0 }
  0x6e   : > { %347 = vst [vmem:[#allocation2 + $0xf8] sm:$0xff] %v2342_v0 }
  0x6f   : > { %348 = vst [vmem:[#allocation2 + $0x20] sm:$0xff] %v2342_v0 }
  0x70   : > { %349 = vst [vmem:[#allocation2 + $0x98] sm:$0xff] %v2342_v0 }
  0x71 PF: > { %v427_v1 = vld [vmem:[%s2559_s7 + $0x168] sm:$0xff]  ;;  %v424_v3 = vld [vmem:[%s2559_s7 + $0x150] sm:$0xff]  ;;  %v421_v5 = vld [vmem:[%s2559_s7 + $0x138] sm:$0xff]  ;;  %p1890_p7 = scmp.ne.s32.totalorder %s2319_s21, 1 }
  0x72   : > { %v475_v2 = vld [vmem:[%s2559_s7 + $0x2e8] sm:$0xff]  ;;  %1901 = vmatpush.msra.mxu2 %v427_v1  ;;  %v472_v4 = vld [vmem:[%s2559_s7 + $0x2d0] sm:$0xff]  ;;  %v469_v6 = vld [vmem:[%s2559_s7 + $0x2b8] sm:$0xff]  ;;  %478 = vmatpush.msra.mxu0 %v427_v1  ;;  %s3396_s28 = sld [smem:[#allocation46_spill]] (!%p1890_p7) }
  0x73   : > { %1917 = vmatpush.msra.mxu3 %v475_v2  ;;  %543 = vmatpush.msra.mxu1 %v475_v2  ;;  %v418_v7 = vld [vmem:[%s2559_s7 + $0x120] sm:$0xff]  ;;  %v415_v9 = vld [vmem:[%s2559_s7 + $0x108] sm:$0xff]  ;;  %v412_v11 = vld [vmem:[%s2559_s7 + $0xf0] sm:$0xff] }
  0x74   : > { %1902 = vmatpush.msra.mxu2 %v424_v3  ;;  %v466_v8 = vld [vmem:[%s2559_s7 + $0x2a0] sm:$0xff]  ;;  %479 = vmatpush.msra.mxu0 %v424_v3  ;;  %v463_v10 = vld [vmem:[%s2559_s7 + $0x288] sm:$0xff]  ;;  %v460_v12 = vld [vmem:[%s2559_s7 + $0x270] sm:$0xff] }
  0x75   : > { %1918 = vmatpush.msra.mxu3 %v472_v4  ;;  %544 = vmatpush.msra.mxu1 %v472_v4  ;;  %v409_v13 = vld [vmem:[%s2559_s7 + $0xd8] sm:$0xff]  ;;  %v406_v15 = vld [vmem:[%s2559_s7 + $0xc0] sm:$0xff]  ;;  %v403_v17 = vld [vmem:[%s2559_s7 + $0xa8] sm:$0xff] }
  0x76   : > { %1903 = vmatpush.msra.mxu2 %v421_v5  ;;  %480 = vmatpush.msra.mxu0 %v421_v5  ;;  %v457_v14 = vld [vmem:[%s2559_s7 + $0x258] sm:$0xff]  ;;  %v454_v16 = vld [vmem:[%s2559_s7 + $0x240] sm:$0xff]  ;;  %v451_v18 = vld [vmem:[%s2559_s7 + $0x228] sm:$0xff] }
  0x77   : > { %1919 = vmatpush.msra.mxu3 %v469_v6  ;;  %545 = vmatpush.msra.mxu1 %v469_v6  ;;  %v400_v19 = vld [vmem:[%s2559_s7 + $0x90] sm:$0xff]  ;;  %v397_v21 = vld [vmem:[%s2559_s7 + $0x78] sm:$0xff]  ;;  %v394_v23 = vld [vmem:[%s2559_s7 + $0x60] sm:$0xff] }
  0x78   : > { %1904 = vmatpush.msra.mxu2 %v418_v7  ;;  %481 = vmatpush.msra.mxu0 %v418_v7  ;;  %v448_v20 = vld [vmem:[%s2559_s7 + $0x210] sm:$0xff]  ;;  %v445_v22 = vld [vmem:[%s2559_s7 + $0x1f8] sm:$0xff]  ;;  %v442_v24 = vld [vmem:[%s2559_s7 + $0x1e0] sm:$0xff] }
  0x79   : > { %1920 = vmatpush.msra.mxu3 %v466_v8  ;;  %546 = vmatpush.msra.mxu1 %v466_v8  ;;  %v391_v25 = vld [vmem:[%s2559_s7 + $0x48] sm:$0xff]  ;;  %v388_v27 = vld [vmem:[%s2559_s7 + $0x30] sm:$0xff]  ;;  %v385_v29 = vld [vmem:[%s2559_s7 + $0x18] sm:$0xff] }
  0x7a   : > { %1905 = vmatpush.msra.mxu2 %v415_v9  ;;  %482 = vmatpush.msra.mxu0 %v415_v9  ;;  %v439_v26 = vld [vmem:[%s2559_s7 + $0x1c8] sm:$0xff]  ;;  %v436_v28 = vld [vmem:[%s2559_s7 + $0x1b0] sm:$0xff]  ;;  %v433_v30 = vld [vmem:[%s2559_s7 + $0x198] sm:$0xff] }
  0x7b   : > { %1921 = vmatpush.msra.mxu3 %v463_v10  ;;  %547 = vmatpush.msra.mxu1 %v463_v10  ;;  %v382_v31 = vld [vmem:[%s2559_s7] sm:$0xff]  ;;  %v2606_v34 = vld [vmem:[%s2551_s18 + $0x88] sm:$0xff]  ;;  %v428_v35 = vld [vmem:[%s2559_s7 + $0x170] sm:$0xff] }
  0x7c   : > { %1906 = vmatpush.msra.mxu2 %v412_v11  ;;  %483 = vmatpush.msra.mxu0 %v412_v11  ;;  %v430_v32 = vld [vmem:[%s2559_s7 + $0x180] sm:$0xff]  ;;  %v476_v36 = vld [vmem:[%s2559_s7 + $0x2f0] sm:$0xff]  ;;  %v425_v37 = vld [vmem:[%s2559_s7 + $0x158] sm:$0xff] }
  0x7d   : > { %1922 = vmatpush.msra.mxu3 %v460_v12  ;;  %548 = vmatpush.msra.mxu1 %v460_v12  ;;  %v2603_v33 = vld [vmem:[%s2551_s18 + $0x80] sm:$0xff]  ;;  %v473_v38 = vld [vmem:[%s2559_s7 + $0x2d8] sm:$0xff]  ;;  %v419_v41 = vld [vmem:[%s2559_s7 + $0x128] sm:$0xff] }
  0x7e   : > { %1907 = vmatpush.msra.mxu2 %v409_v13  ;;  %484 = vmatpush.msra.mxu0 %v409_v13  ;;  %v422_v39 = vld [vmem:[%s2559_s7 + $0x140] sm:$0xff]  ;;  %v467_v42 = vld [vmem:[%s2559_s7 + $0x2a8] sm:$0xff]  ;;  %v2619_v43 = vld [vmem:[%s2551_s18 + $0x90] sm:$0xff] }
  0x7f   : > { %1923 = vmatpush.msra.mxu3 %v457_v14  ;;  %549 = vmatpush.msra.mxu1 %v457_v14  ;;  %v470_v40 = vld [vmem:[%s2559_s7 + $0x2c0] sm:$0xff]  ;;  %v2622_v44 = vld [vmem:[%s2551_s18 + $0x98] sm:$0xff]  ;;  %v416_v45 = vld [vmem:[%s2559_s7 + $0x110] sm:$0xff] }
  0x80   : > { %1908 = vmatpush.msra.mxu2 %v406_v15  ;;  %485 = vmatpush.msra.mxu0 %v406_v15  ;;  %v464_v46 = vld [vmem:[%s2559_s7 + $0x290] sm:$0xff]  ;;  %v413_v47 = vld [vmem:[%s2559_s7 + $0xf8] sm:$0xff]  ;;  %v410_v49 = vld [vmem:[%s2559_s7 + $0xe0] sm:$0xff] }
  0x81   : > { %1924 = vmatpush.msra.mxu3 %v454_v16  ;;  %550 = vmatpush.msra.mxu1 %v454_v16  ;;  %v461_v48 = vld [vmem:[%s2559_s7 + $0x278] sm:$0xff]  ;;  %v458_v50 = vld [vmem:[%s2559_s7 + $0x260] sm:$0xff]  ;;  %v407_v51 = vld [vmem:[%s2559_s7 + $0xc8] sm:$0xff] }
  0x82   : > { %1909 = vmatpush.msra.mxu2 %v403_v17  ;;  %486 = vmatpush.msra.mxu0 %v403_v17  ;;  %v455_v52 = vld [vmem:[%s2559_s7 + $0x248] sm:$0xff]  ;;  %v2635_v53 = vld [vmem:[%s2551_s18 + $0xa0] sm:$0xff]  ;;  %v404_v55 = vld [vmem:[%s2559_s7 + $0xb0] sm:$0xff] }
  0x83   : > { %1925 = vmatpush.msra.mxu3 %v451_v18  ;;  %551 = vmatpush.msra.mxu1 %v451_v18  ;;  %v2638_v54 = vld [vmem:[%s2551_s18 + $0xa8] sm:$0xff]  ;;  %v452_v56 = vld [vmem:[%s2559_s7 + $0x230] sm:$0xff]  ;;  %v401_v57 = vld [vmem:[%s2559_s7 + $0x98] sm:$0xff] }
  0x84   : > { %1910 = vmatpush.msra.mxu2 %v400_v19  ;;  %487 = vmatpush.msra.mxu0 %v400_v19  ;;  %v449_v58 = vld [vmem:[%s2559_s7 + $0x218] sm:$0xff]  ;;  %v398_v59 = vld [vmem:[%s2559_s7 + $0x80] sm:$0xff]  ;;  %v395_v61 = vld [vmem:[%s2559_s7 + $0x68] sm:$0xff] }
  0x85   : > { %1926 = vmatpush.msra.mxu3 %v448_v20  ;;  %552 = vmatpush.msra.mxu1 %v448_v20  ;;  %v446_v60 = vld [vmem:[%s2559_s7 + $0x200] sm:$0xff]  ;;  %v443_v62 = vld [vmem:[%s2559_s7 + $0x1e8] sm:$0xff]  ;;  %v2651_v63 = vld [vmem:[%s2551_s18 + $0xb0] sm:$0xff] }
  0x86   : > { %1911 = vmatpush.msra.mxu2 %v397_v21  ;;  %488 = vmatpush.msra.mxu0 %v397_v21  ;;  %v2654_v0 = vld [vmem:[%s2551_s18 + $0xb8] sm:$0xff]  ;;  %v392_v1 = vld [vmem:[%s2559_s7 + $0x50] sm:$0xff]  ;;  %v386_v5 = vld [vmem:[%s2559_s7 + $0x20] sm:$0xff] }
  0x87   : > { %1927 = vmatpush.msra.mxu3 %v445_v22  ;;  %553 = vmatpush.msra.mxu1 %v445_v22  ;;  %v440_v2 = vld [vmem:[%s2559_s7 + $0x1d0] sm:$0xff]  ;;  %v389_v3 = vld [vmem:[%s2559_s7 + $0x38] sm:$0xff]  ;;  %v434_v6 = vld [vmem:[%s2559_s7 + $0x1a0] sm:$0xff] }
  0x88   : > { %1912 = vmatpush.msra.mxu2 %v394_v23  ;;  %489 = vmatpush.msra.mxu0 %v394_v23  ;;  %v437_v4 = vld [vmem:[%s2559_s7 + $0x1b8] sm:$0xff]  ;;  %v2665_v7 = vld [vmem:[%s2551_s18] sm:$0xff]  ;;  %v383_v8 = vld [vmem:[%s2559_s7 + $0x8] sm:$0xff] }
  0x89   : > { %1928 = vmatpush.msra.mxu3 %v442_v24  ;;  %554 = vmatpush.msra.mxu1 %v442_v24  ;;  %v431_v9 = vld [vmem:[%s2559_s7 + $0x188] sm:$0xff]  ;;  %v2671_v10 = vld [vmem:[%s2551_s18 + $0xc0] sm:$0xff]  ;;  %v2683_v13 = vld [vmem:[%s2551_s18 + $0x10] sm:$0xff] }
  0x8a   : > { %1913 = vmatpush.msra.mxu2 %v391_v25  ;;  %490 = vmatpush.msra.mxu0 %v391_v25  ;;  %3348 = vst [vmem:[#allocation23_spill] sm:$0xff] %v2671_v10  ;;  %v2674_v11 = vld [vmem:[%s2551_s18 + $0xc8] sm:$0xff]  ;;  %v2687_v14 = vld [vmem:[%s2551_s18 + $0xd0] sm:$0xff]  ;;  %v2690_v15 = vld [vmem:[%s2551_s18 + $0xd8] sm:$0xff] }
  0x8b   : > { %1929 = vmatpush.msra.mxu3 %v439_v26  ;;  %555 = vmatpush.msra.mxu1 %v439_v26  ;;  %3349 = vst [vmem:[#allocation24_spill] sm:$0xff] %v2674_v11  ;;  %v2679_v12 = vld [vmem:[%s2551_s18 + $0x8] sm:$0xff]  ;;  %v2695_v16 = vld [vmem:[%s2551_s18 + $0x18] sm:$0xff]  ;;  %v2699_v17 = vld [vmem:[%s2551_s18 + $0x20] sm:$0xff] }
  0x8c   : > { %1914 = vmatpush.msra.mxu2 %v388_v27  ;;  %491 = vmatpush.msra.mxu0 %v388_v27  ;;  %3350 = vst [vmem:[#allocation25_spill] sm:$0xff] %v2687_v14  ;;  %v2703_v18 = vld [vmem:[%s2551_s18 + $0xe0] sm:$0xff]  ;;  %v2706_v19 = vld [vmem:[%s2551_s18 + $0xe8] sm:$0xff]  ;;  %v2715_v21 = vld [vmem:[%s2551_s18 + $0x30] sm:$0xff] }
  0x8d   : > { %1930 = vmatpush.msra.mxu3 %v436_v28  ;;  %556 = vmatpush.msra.mxu1 %v436_v28  ;;  %3351 = vst [vmem:[#allocation26_spill] sm:$0xff] %v2690_v15  ;;  %v2711_v20 = vld [vmem:[%s2551_s18 + $0x28] sm:$0xff]  ;;  %v2719_v22 = vld [vmem:[%s2551_s18 + $0xf0] sm:$0xff]  ;;  %v2722_v23 = vld [vmem:[%s2551_s18 + $0xf8] sm:$0xff] }
  0x8e   : > { %1915 = vmatpush.msra.mxu2 %v385_v29  ;;  %492 = vmatpush.msra.mxu0 %v385_v29  ;;  %3352 = vst [vmem:[#allocation27_spill] sm:$0xff] %v2703_v18  ;;  %v2727_v24 = vld [vmem:[%s2551_s18 + $0x38] sm:$0xff]  ;;  %v2731_v25 = vld [vmem:[%s2551_s18 + $0x40] sm:$0xff]  ;;  %v2737_v26 = vld [vmem:[%s2551_s18 + $0x48] sm:$0xff] }
  0x8f   : > { %1931 = vmatpush.msra.mxu3 %v433_v30  ;;  %557 = vmatpush.msra.mxu1 %v433_v30  ;;  %3353 = vst [vmem:[#allocation28_spill] sm:$0xff] %v2706_v19  ;;  %v2741_v27 = vld [vmem:[%s2551_s18 + $0x50] sm:$0xff]  ;;  %v2747_v28 = vld [vmem:[%s2551_s18 + $0x58] sm:$0xff]  ;;  %v2751_v29 = vld [vmem:[%s2551_s18 + $0x60] sm:$0xff] }
  0x90   : > { %1916 = vmatpush.msra.mxu2 %v382_v31  ;;  %493 = vmatpush.msra.mxu0 %v382_v31  ;;  %3354 = vst [vmem:[#allocation29_spill] sm:$0xff] %v2719_v22  ;;  %v2757_v30 = vld [vmem:[%s2551_s18 + $0x68] sm:$0xff]  ;;  %v2761_v31 = vld [vmem:[%s2551_s18 + $0x70] sm:$0xff] }
  0x91   : > { %1932 = vmatpush.msra.mxu3 %v430_v32  ;;  %518 = vmatmul.f32.vlgmr.msra.gmra.mxu2 %v2603_v33  ;;  %3355 = vst [vmem:[#allocation30_spill] sm:$0xff] %v2722_v23 }
  0x92   : > { %583 = vmatmul.f32.vlgmr.msra.gmra.mxu3 %v2606_v34  ;;  %608 = vmatpush.msrb.mxu2 %v428_v35 }
  0x93   : > { %673 = vmatpush.msrb.mxu3 %v476_v36  ;;  %558 = vmatpush.msra.mxu1 %v430_v32  ;;  %v2767_v32 = vld [vmem:[%s2551_s18 + $0x78] sm:$0xff] }
  0x94   : > { %609 = vmatpush.msrb.mxu2 %v425_v37  ;;  %494 = vmatmul.f32.vlgmr.msra.gmra.mxu0 %v2665_v7 }
  0x95   : > { %674 = vmatpush.msrb.mxu3 %v473_v38  ;;  %559 = vmatmul.f32.vlgmr.msra.gmra.mxu1 %v2679_v12 }
  0x96   : > { %610 = vmatpush.msrb.mxu2 %v422_v39 }
  0x97   : > { %675 = vmatpush.msrb.mxu3 %v470_v40 }
  0x98   : > { %611 = vmatpush.msrb.mxu2 %v419_v41 }
  0x99   : > { %676 = vmatpush.msrb.mxu3 %v467_v42  ;;  %521 = vmatmul.f32.gmra.mxu2 %v2619_v43 }
  0x9a   : > { %586 = vmatmul.f32.gmra.mxu3 %v2622_v44  ;;  %612 = vmatpush.msrb.mxu2 %v416_v45 }
  0x9b   : > { %677 = vmatpush.msrb.mxu3 %v464_v46 }
  0x9c   : > { %613 = vmatpush.msrb.mxu2 %v413_v47  ;;  %497 = vmatmul.f32.gmra.mxu0 %v2683_v13 }
  0x9d   : > { %678 = vmatpush.msrb.mxu3 %v461_v48  ;;  %562 = vmatmul.f32.gmra.mxu1 %v2695_v16 }
  0x9e   : > { %614 = vmatpush.msrb.mxu2 %v410_v49 }
  0x9f   : > { %679 = vmatpush.msrb.mxu3 %v458_v50 }
  0xa0   : > { %615 = vmatpush.msrb.mxu2 %v407_v51 }
  0xa1   : > { %680 = vmatpush.msrb.mxu3 %v455_v52  ;;  %524 = vmatmul.f32.gmra.mxu2 %v2635_v53 }
  0xa2   : > { %589 = vmatmul.f32.gmra.mxu3 %v2638_v54  ;;  %616 = vmatpush.msrb.mxu2 %v404_v55 }
  0xa3   : > { %681 = vmatpush.msrb.mxu3 %v452_v56 }
  0xa4   : > { %617 = vmatpush.msrb.mxu2 %v401_v57  ;;  %500 = vmatmul.f32.gmra.mxu0 %v2699_v17 }
  0xa5   : > { %682 = vmatpush.msrb.mxu3 %v449_v58  ;;  %565 = vmatmul.f32.gmra.mxu1 %v2711_v20 }
  0xa6   : > { %618 = vmatpush.msrb.mxu2 %v398_v59 }
  0xa7   : > { %683 = vmatpush.msrb.mxu3 %v446_v60 }
  0xa8   : > { %619 = vmatpush.msrb.mxu2 %v395_v61 }
  0xa9   : > { %684 = vmatpush.msrb.mxu3 %v443_v62  ;;  %527 = vmatmul.f32.gmra.mxu2 %v2651_v63 }
  0xaa   : > { %592 = vmatmul.f32.gmra.mxu3 %v2654_v0  ;;  %620 = vmatpush.msrb.mxu2 %v392_v1 }
  0xab   : > { %685 = vmatpush.msrb.mxu3 %v440_v2 }
  0xac   : > { %621 = vmatpush.msrb.mxu2 %v389_v3  ;;  %503 = vmatmul.f32.gmra.mxu0 %v2715_v21 }
  0xad   : > { %686 = vmatpush.msrb.mxu3 %v437_v4  ;;  %568 = vmatmul.f32.gmra.mxu1 %v2727_v24 }
  0xae   : > { %622 = vmatpush.msrb.mxu2 %v386_v5 }
  0xaf   : > { %687 = vmatpush.msrb.mxu3 %v434_v6 }
  0xb0   : > { %623 = vmatpush.msrb.mxu2 %v383_v8 }
  0xb1   : > { %688 = vmatpush.msrb.mxu3 %v431_v9  ;;  %530 = vmatmul.f32.gmra.mxu2 %v2671_v10 }
  0xb2   : > { %595 = vmatmul.f32.gmra.mxu3 %v2674_v11 }
  0xb4   : > { %506 = vmatmul.f32.gmra.mxu0 %v2731_v25 }
  0xb5   : > { %571 = vmatmul.f32.gmra.mxu1 %v2737_v26 }
  0xb9   : > { %533 = vmatmul.f32.gmra.mxu2 %v2687_v14 }
  0xba   : > { %598 = vmatmul.f32.gmra.mxu3 %v2690_v15 }
  0xbc   : > { %509 = vmatmul.f32.gmra.mxu0 %v2741_v27 }
  0xbd   : > { %574 = vmatmul.f32.gmra.mxu1 %v2747_v28 }
  0xc1   : > { %536 = vmatmul.f32.gmra.mxu2 %v2703_v18 }
  0xc2   : > { %601 = vmatmul.f32.gmra.mxu3 %v2706_v19 }
  0xc4   : > { %512 = vmatmul.f32.gmra.mxu0 %v2751_v29 }
  0xc5   : > { %577 = vmatmul.f32.gmra.mxu1 %v2757_v30 }
  0xc9   : > { %539 = vmatmul.f32.gmra.mxu2 %v2719_v22 }
  0xca   : > { %604 = vmatmul.f32.gmra.mxu3 %v2722_v23 }
  0xcc   : > { %515 = vmatmul.f32.gmra.mxu0 %v2761_v31 }
  0xcd   : > { %580 = vmatmul.f32.gmra.mxu1 %v2767_v32 }
  0xd1   : > { %624 = vmatmul.f32.vlgmr.msrb.gmra.mxu2 %v2665_v7 }
  0xd2   : > { %689 = vmatmul.f32.vlgmr.msrb.gmra.mxu3 %v2679_v12 }
  0xd9   : > { %627 = vmatmul.f32.gmra.mxu2 %v2683_v13 }
  0xda   : > { %692 = vmatmul.f32.gmra.mxu3 %v2695_v16 }
  0xe1   : > { %630 = vmatmul.f32.gmra.mxu2 %v2699_v17 }
  0xe2   : > { %695 = vmatmul.f32.gmra.mxu3 %v2711_v20 }
  0xe9   : > { %633 = vmatmul.f32.gmra.mxu2 %v2715_v21 }
  0xea   : > { %698 = vmatmul.f32.gmra.mxu3 %v2727_v24 }
  0xf1   : > { %636 = vmatmul.f32.gmra.mxu2 %v2731_v25 }
  0xf2   : > { %701 = vmatmul.f32.gmra.mxu3 %v2737_v26 }
  0xf9   : > { %639 = vmatmul.f32.gmra.mxu2 %v2741_v27 }
  0xfa   : > { %704 = vmatmul.f32.gmra.mxu3 %v2747_v28 }
 0x101   : > { %642 = vmatmul.f32.gmra.mxu2 %v2751_v29 }
 0x102   : > { %707 = vmatmul.f32.gmra.mxu3 %v2757_v30 }
 0x109   : > { %645 = vmatmul.f32.gmra.mxu2 %v2761_v31 }
 0x10a   : > { %710 = vmatmul.f32.gmra.mxu3 %v2767_v32 }
 0x111   : > { %648 = vmatmul.f32.gmra.mxu2 %v2603_v33 }
 0x112   : > { %713 = vmatmul.f32.gmra.mxu3 %v2606_v34 }
 0x114   : > { %v2780_v35 = vpop.f32.mrf.mxu2 }
 0x115   : > { %v2782_v36 = vpop.f32.mrf.mxu3 }
 0x119   : > { %651 = vmatmul.f32.gmra.mxu2 %v2619_v43 }
 0x11a   : > { %716 = vmatmul.f32.gmra.mxu3 %v2622_v44 }
 0x11c   : > { %v2786_v37 = vpop.f32.mrf.mxu2 }
 0x11d   : > { %3356 = vst [vmem:[#allocation31_spill] sm:$0xff] %v2786_v37  ;;  %v2788_v38 = vpop.f32.mrf.mxu3  ;;  %v471_v37 = vld [vmem:[%s2559_s7 + $0x2c8] sm:$0xff] }
 0x11e   : > { %3357 = vst [vmem:[#allocation32_spill] sm:$0xff] %v2788_v38  ;;  %v423_v38 = vld [vmem:[%s2559_s7 + $0x148] sm:$0xff] }
 0x121   : > { %654 = vmatmul.f32.gmra.mxu2 %v2635_v53 }
 0x122   : > { %719 = vmatmul.f32.gmra.mxu3 %v2638_v54 }
 0x124   : > { %v2792_v39 = vpop.f32.mrf.mxu2 }
 0x125   : > { %3358 = vst [vmem:[#allocation33_spill] sm:$0xff] %v2792_v39  ;;  %v2794_v40 = vpop.f32.mrf.mxu3 }
 0x126   : > { %3359 = vst [vmem:[#allocation34_spill] sm:$0xff] %v2794_v40 }
 0x129   : > { %657 = vmatmul.f32.gmra.mxu2 %v2651_v63 }
 0x12a   : > { %722 = vmatmul.f32.gmra.mxu3 %v2654_v0 }
 0x12c   : > { %v2798_v41 = vpop.f32.mrf.mxu2 }
 0x12d   : > { %3360 = vst [vmem:[#allocation35_spill] sm:$0xff] %v2798_v41  ;;  %v2800_v42 = vpop.f32.mrf.mxu3 }
 0x12e   : > { %3361 = vst [vmem:[#allocation36_spill] sm:$0xff] %v2800_v42 }
 0x131   : > { %660 = vmatmul.f32.gmra.mxu2 %v2671_v10  ;;  %v474_v10 = vld [vmem:[%s2559_s7 + $0x2e0] sm:$0xff] }
 0x132   : > { %725 = vmatmul.f32.gmra.mxu3 %v2674_v11  ;;  %v426_v11 = vld [vmem:[%s2559_s7 + $0x160] sm:$0xff] }
 0x134   : > { %v2804_v45 = vpop.f32.mrf.mxu2 }
 0x135   : > { %3362 = vst [vmem:[#allocation37_spill] sm:$0xff] %v2804_v45  ;;  %v2806_v46 = vpop.f32.mrf.mxu3 }
 0x136   : > { %3363 = vst [vmem:[#allocation38_spill] sm:$0xff] %v2806_v46 }
 0x139   : > { %663 = vmatmul.f32.gmra.mxu2 %v2687_v14 }
 0x13a   : > { %728 = vmatmul.f32.gmra.mxu3 %v2690_v15 }
 0x13c   : > { %v2810_v47 = vpop.f32.mrf.mxu2 }
 0x13d   : > { %3364 = vst [vmem:[#allocation39_spill] sm:$0xff] %v2810_v47  ;;  %v2812_v48 = vpop.f32.mrf.mxu3 }
 0x13e   : > { %3365 = vst [vmem:[#allocation40_spill] sm:$0xff] %v2812_v48 }
 0x141   : > { %666 = vmatmul.f32.gmra.mxu2 %v2703_v18 }
 0x142   : > { %731 = vmatmul.f32.gmra.mxu3 %v2706_v19 }
 0x144   : > { %v2816_v49 = vpop.f32.mrf.mxu2 }
 0x145   : > { %3366 = vst [vmem:[#allocation41_spill] sm:$0xff] %v2816_v49  ;;  %v2818_v50 = vpop.f32.mrf.mxu3 }
 0x146   : > { %3367 = vst [vmem:[#allocation42_spill] sm:$0xff] %v2818_v50 }
 0x149   : > { %669 = vmatmul.f32.gmra.mxu2 %v2719_v22 }
 0x14a   : > { %734 = vmatmul.f32.gmra.mxu3 %v2722_v23 }
 0x14c   : > { %v2822_v51 = vpop.f32.mrf.mxu2 }
 0x14d   : > { %3368 = vst [vmem:[#allocation43_spill] sm:$0xff] %v2822_v51  ;;  %v2824_v52 = vpop.f32.mrf.mxu3 }
 0x14e   : > { %3369 = vst [vmem:[#allocation44_spill] sm:$0xff] %v2824_v52 }
 0x154   : > { %v2826_v55 = vpop.f32.mrf.mxu2 }
 0x155   : > { %v2828_v56 = vpop.f32.mrf.mxu3 }
 0x15c   : > { %v2830_v57 = vpop.f32.mrf.mxu2 }
 0x15d   : > { %v2832_v58 = vpop.f32.mrf.mxu3 }
 0x164   : > { %v2834_v59 = vpop.f32.mrf.mxu2 }
 0x165   : > { %v2836_v60 = vpop.f32.mrf.mxu3 }
 0x16c   : > { %v2838_v61 = vpop.f32.mrf.mxu2 }
 0x16d   : > { %v2840_v62 = vpop.f32.mrf.mxu3 }
 0x174   : > { %v2842_v1 = vpop.f32.mrf.mxu2 }
 0x175   : > { %v2844_v2 = vpop.f32.mrf.mxu3 }
 0x17c   : > { %v2846_v3 = vpop.f32.mrf.mxu2 }
 0x17d   : > { %v2848_v4 = vpop.f32.mrf.mxu3 }
 0x184   : > { %v2850_v5 = vpop.f32.mrf.mxu2 }
 0x185   : > { %v2852_v6 = vpop.f32.mrf.mxu3 }
 0x18c   : > { %v2854_v8 = vpop.f32.mrf.mxu2 }
 0x18d   : > { %v2856_v9 = vpop.f32.mrf.mxu3 }
 0x194   : > { %v649_v52 = vpop.f32.mrf.mxu2 }
 0x195   : > { %v714_v51 = vpop.f32.mrf.mxu3 }
 0x196   : > { %v2858_v50 = vadd.f32 %v714_v51, %v649_v52 }
 0x19c   : > { %v652_v49 = vpop.f32.mrf.mxu2 }
 0x19d   : > { %v717_v48 = vpop.f32.mrf.mxu3 }
 0x19e   : > { %v2860_v47 = vadd.f32 %v717_v48, %v652_v49  ;;  %v429_v48 = vld [vmem:[%s2559_s7 + $0x178] sm:$0xff] }
 0x19f   : > { %v477_v49 = vld [vmem:[%s2559_s7 + $0x2f8] sm:$0xff]  ;;  %738 = vmatpush.msrb.mxu0 %v429_v48 }
 0x1a0   : > { %803 = vmatpush.msrb.mxu1 %v477_v49  ;;  %v417_v48 = vld [vmem:[%s2559_s7 + $0x118] sm:$0xff] }
 0x1a1   : > { %739 = vmatpush.msrb.mxu0 %v426_v11  ;;  %v462_v11 = vld [vmem:[%s2559_s7 + $0x280] sm:$0xff] }
 0x1a2   : > { %804 = vmatpush.msrb.mxu1 %v474_v10  ;;  %v414_v10 = vld [vmem:[%s2559_s7 + $0x100] sm:$0xff] }
 0x1a3   : > { %740 = vmatpush.msrb.mxu0 %v423_v38  ;;  %v411_v38 = vld [vmem:[%s2559_s7 + $0xe8] sm:$0xff] }
 0x1a4   : > { %v655_v23 = vpop.f32.mrf.mxu2  ;;  %805 = vmatpush.msrb.mxu1 %v471_v37  ;;  %v459_v37 = vld [vmem:[%s2559_s7 + $0x268] sm:$0xff] }
 0x1a5   : > { %v720_v22 = vpop.f32.mrf.mxu3 }
 0x1a6   : > { %v721_v49 = vadd.f32 %v720_v22, %v655_v23  ;;  %v444_v22 = vld [vmem:[%s2559_s7 + $0x1f0] sm:$0xff]  ;;  %v393_v23 = vld [vmem:[%s2559_s7 + $0x58] sm:$0xff] }
 0x1ac   : > { %v658_v46 = vpop.f32.mrf.mxu2 }
 0x1ad   : > { %v723_v45 = vpop.f32.mrf.mxu3 }
 0x1b4   : > { %v661_v19 = vpop.f32.mrf.mxu2 }
 0x1b5   : > { %v726_v18 = vpop.f32.mrf.mxu3 }
 0x1bc   : > { %v664_v42 = vpop.f32.mrf.mxu2 }
 0x1bd   : > { %v729_v41 = vpop.f32.mrf.mxu3 }
 0x1c4   : > { %v667_v15 = vpop.f32.mrf.mxu2 }
 0x1c5   : > { %v732_v51 = vpop.f32.mrf.mxu3 }
 0x1c6   : > { %v733_v39 = vadd.f32 %v732_v51, %v667_v15  ;;  %v465_v15 = vld [vmem:[%s2559_s7 + $0x298] sm:$0xff] }
 0x1c7   : > { %v453_v51 = vld [vmem:[%s2559_s7 + $0x238] sm:$0xff] }
 0x1cc   : > { %v670_v52 = vpop.f32.mrf.mxu2 }
 0x1cd   : > { %v735_v14 = vpop.f32.mrf.mxu3 }
 0x1ce   : > { %v736_v40 = vadd.f32 %v735_v14, %v670_v52  ;;  %v730_v14 = vadd.f32 %v729_v41, %v664_v42  ;;  %v468_v52 = vld [vmem:[%s2559_s7 + $0x2b0] sm:$0xff]  ;;  %v724_v41 = vadd.f32 %v723_v45, %v658_v46  ;;  %v405_v42 = vld [vmem:[%s2559_s7 + $0xb8] sm:$0xff]  ;;  %v402_v45 = vld [vmem:[%s2559_s7 + $0xa0] sm:$0xff] }
 0x1cf   : > { %806 = vmatpush.msrb.mxu1 %v468_v52  ;;  %v450_v46 = vld [vmem:[%s2559_s7 + $0x220] sm:$0xff]  ;;  %v396_v52 = vld [vmem:[%s2559_s7 + $0x70] sm:$0xff] }
 0x1d0   : > { %884 = vmatpush.xpose.msra.mxu2 %v736_v40  ;;  %v420_v40 = vld [vmem:[%s2559_s7 + $0x130] sm:$0xff] }
 0x1d1   : > { %741 = vmatpush.msrb.mxu0 %v420_v40  ;;  %807 = vmatpush.msrb.mxu1 %v465_v15  ;;  %v447_v40 = vld [vmem:[%s2559_s7 + $0x208] sm:$0xff]  ;;  %v390_v15 = vld [vmem:[%s2559_s7 + $0x40] sm:$0xff] }
 0x1d3   : > { %742 = vmatpush.msrb.mxu0 %v417_v48  ;;  %808 = vmatpush.msrb.mxu1 %v462_v11  ;;  %v441_v48 = vld [vmem:[%s2559_s7 + $0x1d8] sm:$0xff]  ;;  %v435_v11 = vld [vmem:[%s2559_s7 + $0x1a8] sm:$0xff] }
 0x1d4   : > { %885 = vmatpush.xpose.msra.mxu2 %v733_v39  ;;  %v727_v39 = vadd.f32 %v726_v18, %v661_v19  ;;  %v408_v18 = vld [vmem:[%s2559_s7 + $0xd0] sm:$0xff] }
 0x1d5   : > { %743 = vmatpush.msrb.mxu0 %v414_v10  ;;  %809 = vmatpush.msrb.mxu1 %v459_v37  ;;  %v456_v19 = vld [vmem:[%s2559_s7 + $0x250] sm:$0xff]  ;;  %v387_v10 = vld [vmem:[%s2559_s7 + $0x28] sm:$0xff] }
 0x1d6   : > { %v432_v37 = vld [vmem:[%s2559_s7 + $0x190] sm:$0xff] }
 0x1d7   : > { %744 = vmatpush.msrb.mxu0 %v411_v38  ;;  %810 = vmatpush.msrb.mxu1 %v456_v19  ;;  %v384_v38 = vld [vmem:[%s2559_s7 + $0x10] sm:$0xff] }
 0x1d8   : > { %886 = vmatpush.xpose.msra.mxu2 %v730_v14  ;;  %v399_v14 = vld [vmem:[%s2559_s7 + $0x88] sm:$0xff] }
 0x1d9   : > { %745 = vmatpush.msrb.mxu0 %v408_v18  ;;  %811 = vmatpush.msrb.mxu1 %v453_v51  ;;  %v703_v18 = vadd.f32 %v2844_v2, %v2842_v1 }
 0x1db   : > { %746 = vmatpush.msrb.mxu0 %v405_v42  ;;  %812 = vmatpush.msrb.mxu1 %v450_v46  ;;  %v3372_v46 = vld [vmem:[#allocation23_spill] sm:$0xff] }
 0x1dc   : > { %887 = vmatpush.xpose.msra.mxu2 %v727_v39  ;;  %v438_v39 = vld [vmem:[%s2559_s7 + $0x1c0] sm:$0xff] }
 0x1dd   : > { %747 = vmatpush.msrb.mxu0 %v402_v45  ;;  %813 = vmatpush.msrb.mxu1 %v447_v40  ;;  %v3371_v45 = vld [vmem:[#allocation32_spill] sm:$0xff]  ;;  %v3375_v40 = vld [vmem:[#allocation34_spill] sm:$0xff] }
 0x1df   : > { %748 = vmatpush.msrb.mxu0 %v399_v14  ;;  %814 = vmatpush.msrb.mxu1 %v444_v22  ;;  %v3373_v14 = vld [vmem:[#allocation24_spill] sm:$0xff]  ;;  %v3376_v22 = vld [vmem:[#allocation25_spill] sm:$0xff] }
 0x1e0   : > { %888 = vmatpush.xpose.msra.mxu2 %v724_v41  ;;  %v709_v41 = vadd.f32 %v2852_v6, %v2850_v5 }
 0x1e1   : > { %749 = vmatpush.msrb.mxu0 %v396_v52  ;;  %815 = vmatpush.msrb.mxu1 %v441_v48  ;;  %v3380_v48 = vld [vmem:[#allocation27_spill] sm:$0xff] }
 0x1e3   : > { %750 = vmatpush.msrb.mxu0 %v393_v23  ;;  %816 = vmatpush.msrb.mxu1 %v438_v39 }
 0x1e4   : > { %889 = vmatpush.xpose.msra.mxu2 %v721_v49 }
 0x1e5   : > { %751 = vmatpush.msrb.mxu0 %v390_v15  ;;  %817 = vmatpush.msrb.mxu1 %v435_v11  ;;  %v3381_v15 = vld [vmem:[#allocation28_spill] sm:$0xff] }
 0x1e7   : > { %752 = vmatpush.msrb.mxu0 %v387_v10  ;;  %818 = vmatpush.msrb.mxu1 %v432_v37  ;;  %v3383_v10 = vld [vmem:[#allocation38_spill] sm:$0xff] }
 0x1e8   : > { %890 = vmatpush.xpose.msra.mxu2 %v2860_v47  ;;  %v712_v47 = vadd.f32 %v2856_v9, %v2854_v8  ;;  %819 = vmatmul.f32.vlgmr.msrb.gmra.mxu1 %v2679_v12  ;;  %v495_v8 = vpop.f32.mrf.mxu0  ;;  %v560_v9 = vpop.f32.mrf.mxu1  ;;  %v3385_v37 = vld [vmem:[#allocation30_spill] sm:$0xff] }
 0x1e9   : > { %753 = vmatpush.msrb.mxu0 %v384_v38  ;;  %v561_v1 = vadd.f32 %v560_v9, %v495_v8  ;;  %v3384_v38 = vld [vmem:[#allocation29_spill] sm:$0xff]  ;;  %v3386_v8 = vld [vmem:[#allocation39_spill] sm:$0xff]  ;;  %v3387_v9 = vld [vmem:[#allocation40_spill] sm:$0xff] }
 0x1ea   : > { %754 = vmatmul.f32.vlgmr.msrb.gmra.mxu0 %v2665_v7  ;;  %v700_v7 = vadd.f32 %v2840_v62, %v2838_v61 }
 0x1eb   : > { %v868_v2 = vmul.f32 0.088388346, %v561_v1 }
 0x1ec   : > { %891 = vmatpush.xpose.msra.mxu2 %v2858_v50  ;;  %v706_v50 = vadd.f32 %v2848_v4, %v2846_v3  ;;  %v697_v3 = vadd.f32 %v2836_v60, %v2834_v59 }
 0x1f0   : > { %892 = vmatpush.xpose.msra.mxu2 %v712_v47  ;;  %822 = vmatmul.f32.gmra.mxu1 %v2695_v16  ;;  %v498_v5 = vpop.f32.mrf.mxu0  ;;  %v563_v12 = vpop.f32.mrf.mxu1  ;;  %v691_v16 = vadd.f32 %v2828_v56, %v2826_v55  ;;  %v3382_v47 = vld [vmem:[#allocation37_spill] sm:$0xff] }
 0x1f1   : > { %v597_v11 = vadd.f32 %v3383_v10, %v3382_v47 }
 0x1f2   : > { %757 = vmatmul.f32.gmra.mxu0 %v2683_v13  ;;  %v694_v13 = vadd.f32 %v2832_v58, %v2830_v57 }
 0x1f4   : > { %893 = vmatpush.xpose.msra.mxu2 %v709_v41  ;;  %v880_v41 = vmul.f32 0.088388346, %v597_v11 }
 0x1f8   : > { %894 = vmatpush.xpose.msra.mxu2 %v706_v50  ;;  %825 = vmatmul.f32.gmra.mxu1 %v2711_v20  ;;  %v501_v61 = vpop.f32.mrf.mxu0  ;;  %v566_v62 = vpop.f32.mrf.mxu1 }
 0x1f9   : > { %v567_v58 = vadd.f32 %v566_v62, %v501_v61 }
 0x1fa   : > { %760 = vmatmul.f32.gmra.mxu0 %v2699_v17  ;;  %v564_v17 = vadd.f32 %v563_v12, %v498_v5 }
 0x1fb   : > { %v870_v55 = vmul.f32 0.088388346, %v567_v58 }
 0x1fc   : > { %895 = vmatpush.xpose.msra.mxu2 %v703_v18  ;;  %v869_v59 = vmul.f32 0.088388346, %v564_v17  ;;  %v600_v18 = vadd.f32 %v3387_v9, %v3386_v8  ;;  %v3391_v17 = vld [vmem:[#allocation44_spill] sm:$0xff] }
 0x1fe   : > { %v881_v5 = vmul.f32 0.088388346, %v600_v18 }
 0x200   : > { %896 = vmatpush.xpose.msra.mxu2 %v700_v7  ;;  %828 = vmatmul.f32.gmra.mxu1 %v2727_v24  ;;  %v504_v20 = vpop.f32.mrf.mxu0  ;;  %v569_v57 = vpop.f32.mrf.mxu1 }
 0x201   : > { %v570_v24 = vadd.f32 %v569_v57, %v504_v20 }
 0x202   : > { %763 = vmatmul.f32.gmra.mxu0 %v2715_v21 }
 0x203   : > { %v871_v60 = vmul.f32 0.088388346, %v570_v24 }
 0x204   : > { %897 = vmatpush.xpose.msra.mxu2 %v697_v3  ;;  %v3388_v3 = vld [vmem:[#allocation41_spill] sm:$0xff] }
 0x208   : > { %898 = vmatpush.xpose.msra.mxu2 %v694_v13  ;;  %831 = vmatmul.f32.gmra.mxu1 %v2737_v26  ;;  %v507_v21 = vpop.f32.mrf.mxu0  ;;  %v572_v56 = vpop.f32.mrf.mxu1  ;;  %v3389_v13 = vld [vmem:[#allocation42_spill] sm:$0xff] }
 0x209   : > { %v603_v1 = vadd.f32 %v3389_v13, %v3388_v3 }
 0x20a   : > { %766 = vmatmul.f32.gmra.mxu0 %v2731_v25  ;;  %v573_v25 = vadd.f32 %v572_v56, %v507_v21 }
 0x20b   : > { %v882_v61 = vmul.f32 0.088388346, %v603_v1 }
 0x20c   : > { %899 = vmatpush.xpose.msra.mxu2 %v691_v16  ;;  %v872_v6 = vmul.f32 0.088388346, %v573_v25 }
 0x20f   : > { %900 = vmatmul.f32.vlgmr.msra.gmra.mxu2 %v868_v2  ;;  %v3390_v2 = vld [vmem:[#allocation43_spill] sm:$0xff] }
 0x210   : > { %834 = vmatmul.f32.gmra.mxu1 %v2747_v28  ;;  %v510_v4 = vpop.f32.mrf.mxu0  ;;  %v575_v26 = vpop.f32.mrf.mxu1 }
 0x212   : > { %769 = vmatmul.f32.gmra.mxu0 %v2741_v27  ;;  %v576_v27 = vadd.f32 %v575_v26, %v510_v4 }
 0x214   : > { %v873_v42 = vmul.f32 0.088388346, %v576_v27 }
 0x217   : > { %903 = vmatmul.f32.gmra.mxu2 %v869_v59  ;;  %v606_v59 = vadd.f32 %v3391_v17, %v3390_v2 }
 0x218   : > { %837 = vmatmul.f32.gmra.mxu1 %v2757_v30  ;;  %v513_v28 = vpop.f32.mrf.mxu0  ;;  %v578_v19 = vpop.f32.mrf.mxu1 }
 0x219   : > { %v883_v57 = vmul.f32 0.088388346, %v606_v59 }
 0x21a   : > { %772 = vmatmul.f32.gmra.mxu0 %v2751_v29  ;;  %v579_v29 = vadd.f32 %v578_v19, %v513_v28 }
 0x21c   : > { %v874_v30 = vmul.f32 0.088388346, %v579_v29 }
 0x21f   : > { %906 = vmatmul.f32.gmra.mxu2 %v870_v55 }
 0x220   : > { %840 = vmatmul.f32.gmra.mxu1 %v2767_v32  ;;  %v516_v51 = vpop.f32.mrf.mxu0  ;;  %v581_v49 = vpop.f32.mrf.mxu1 }
 0x222   : > { %775 = vmatmul.f32.gmra.mxu0 %v2761_v31  ;;  %v582_v31 = vadd.f32 %v581_v49, %v516_v51 }
 0x224   : > { %v875_v32 = vmul.f32 0.088388346, %v582_v31 }
 0x227   : > { %909 = vmatmul.f32.gmra.mxu2 %v871_v60 }
 0x228   : > { %843 = vmatmul.f32.gmra.mxu1 %v2606_v34 }
 0x22a   : > { %778 = vmatmul.f32.gmra.mxu0 %v2603_v33  ;;  %v585_v33 = vadd.f32 %v2782_v36, %v2780_v35  ;;  %v3377_v35 = vld [vmem:[#allocation26_spill] sm:$0xff]  ;;  %v3379_v36 = vld [vmem:[#allocation36_spill] sm:$0xff] }
 0x22c   : > { %v876_v34 = vmul.f32 0.088388346, %v585_v33 }
 0x22f   : > { %912 = vmatmul.f32.gmra.mxu2 %v872_v6 }
 0x230   : > { %846 = vmatmul.f32.gmra.mxu1 %v2622_v44 }
 0x232   : > { %781 = vmatmul.f32.gmra.mxu0 %v2619_v43  ;;  %v3370_v43 = vld [vmem:[#allocation31_spill] sm:$0xff] }
 0x233   : > { %v588_v44 = vadd.f32 %v3371_v45, %v3370_v43 }
 0x237   : > { %915 = vmatmul.f32.gmra.mxu2 %v873_v42 }
 0x238   : > { %849 = vmatmul.f32.gmra.mxu1 %v2638_v54  ;;  %v3374_v54 = vld [vmem:[#allocation33_spill] sm:$0xff] }
 0x239   : > { %v591_v52 = vadd.f32 %v3375_v40, %v3374_v54 }
 0x23a   : > { %784 = vmatmul.f32.gmra.mxu0 %v2635_v53  ;;  %v877_v53 = vmul.f32 0.088388346, %v588_v44 }
 0x23f   : > { %918 = vmatmul.f32.gmra.mxu2 %v874_v30 }
 0x240   : > { %852 = vmatmul.f32.gmra.mxu1 %v2654_v0  ;;  %v3378_v0 = vld [vmem:[#allocation35_spill] sm:$0xff] }
 0x241   : > { %v594_v23 = vadd.f32 %v3379_v36, %v3378_v0 }
 0x242   : > { %787 = vmatmul.f32.gmra.mxu0 %v2651_v63  ;;  %v878_v63 = vmul.f32 0.088388346, %v591_v52 }
 0x243   : > { %v879_v39 = vmul.f32 0.088388346, %v594_v23 }
 0x247   : > { %921 = vmatmul.f32.gmra.mxu2 %v875_v32 }
 0x248   : > { %855 = vmatmul.f32.gmra.mxu1 %v3373_v14 }
 0x24a   : > { %790 = vmatmul.f32.gmra.mxu0 %v3372_v46 }
 0x24f   : > { %924 = vmatmul.f32.gmra.mxu2 %v876_v34 }
 0x250   : > { %858 = vmatmul.f32.gmra.mxu1 %v3377_v35 }
 0x252   : > { %793 = vmatmul.f32.gmra.mxu0 %v3376_v22 }
 0x257   : > { %927 = vmatmul.f32.gmra.mxu2 %v877_v53 }
 0x258   : > { %861 = vmatmul.f32.gmra.mxu1 %v3381_v15 }
 0x25a   : > { %796 = vmatmul.f32.gmra.mxu0 %v3380_v48 }
 0x25f   : > { %930 = vmatmul.f32.gmra.mxu2 %v878_v63 }
 0x260   : > { %864 = vmatmul.f32.gmra.mxu1 %v3385_v37 }
 0x262   : > { %799 = vmatmul.f32.gmra.mxu0 %v3384_v38 }
 0x265   : > { %v2958_v7 = vpop.f32.mrf.mxu1 }
 0x267   : > { %933 = vmatmul.f32.gmra.mxu2 %v879_v39  ;;  %v2954_v50 = vpop.f32.mrf.mxu0 }
 0x268   : > { %v821_v13 = vadd.f32 %v2958_v7, %v2954_v50 }
 0x26d   : > { %v2964_v16 = vpop.f32.mrf.mxu1 }
 0x26f   : > { %936 = vmatmul.f32.gmra.mxu2 %v880_v41  ;;  %v2960_v12 = vpop.f32.mrf.mxu0 }
 0x270   : > { %v824_v18 = vadd.f32 %v2964_v16, %v2960_v12 }
 0x275   : > { %v2970_v20 = vpop.f32.mrf.mxu1 }
 0x277   : > { %939 = vmatmul.f32.gmra.mxu2 %v881_v5  ;;  %v2966_v62 = vpop.f32.mrf.mxu0 }
 0x278   : > { %v827_v9 = vadd.f32 %v2970_v20, %v2966_v62 }
 0x27d   : > { %v2974_v55 = vpop.f32.mrf.mxu1 }
 0x27f   : > { %942 = vmatmul.f32.gmra.mxu2 %v882_v61  ;;  %v2972_v58 = vpop.f32.mrf.mxu0 }
 0x280   : > { %v830_v8 = vadd.f32 %v2974_v55, %v2972_v58 }
 0x285   : > { %v832_v56 = vpop.f32.mrf.mxu1 }
 0x287   : > { %945 = vmatmul.f32.gmra.mxu2 %v883_v57  ;;  %v767_v21 = vpop.f32.mrf.mxu0 }
 0x288   : > { %v833_v41 = vadd.f32 %v832_v56, %v767_v21 }
 0x28d   : > { %v835_v25 = vpop.f32.mrf.mxu1 }
 0x28f   : > { %v770_v60 = vpop.f32.mrf.mxu0 }
 0x290   : > { %v836_v37 = vadd.f32 %v835_v25, %v770_v60 }
 0x292   : > { %v2976_v24 = vpop.f32.mrf.mxu2 }
 0x293   : > { %949 = vmax.xlane.f32.xlu0 %v2976_v24 }
 0x295   : > { %v838_v6 = vpop.f32.mrf.mxu1 }
 0x297   : > { %v773_v26 = vpop.f32.mrf.mxu0 }
 0x298   : > { %v839_v38 = vadd.f32 %v838_v6, %v773_v26 }
 0x29a   : > { %v2979_v4 = vpop.f32.mrf.mxu2 }
 0x29b   : > { %951 = vmax.xlane.f32.xlu0 %v2979_v4 }
 0x29d   : > { %v841_v19 = vpop.f32.mrf.mxu1 }
 0x29f   : > { %v776_v28 = vpop.f32.mrf.mxu0 }
 0x2a0   : > { %v842_v11 = vadd.f32 %v841_v19, %v776_v28 }
 0x2a2   : > { %v2982_v27 = vpop.f32.mrf.mxu2 }
 0x2a3   : > { %953 = vmax.xlane.f32.xlu1 %v2982_v27 }
 0x2a5   : > { %v844_v30 = vpop.f32.mrf.mxu1 }
 0x2a7   : > { %v779_v29 = vpop.f32.mrf.mxu0 }
 0x2a8   : > { %v845_v49 = vadd.f32 %v844_v30, %v779_v29 }
 0x2aa   : > { %v2985_v42 = vpop.f32.mrf.mxu2 }
 0x2ab   : > { %955 = vmax.xlane.f32.xlu1 %v2985_v42 }
 0x2ad   : > { %v847_v32 = vpop.f32.mrf.mxu1 }
 0x2af   : > { %v782_v31 = vpop.f32.mrf.mxu0 }
 0x2b0   : > { %v848_v10 = vadd.f32 %v847_v32, %v782_v31 }
 0x2b2   : > { %v2988_v51 = vpop.f32.mrf.mxu2 }
 0x2b3   : > { %957 = vmax.xlane.f32.xlu2 %v2988_v51 }
 0x2b5   : > { %v850_v43 = vpop.f32.mrf.mxu1 }
 0x2b7   : > { %v785_v34 = vpop.f32.mrf.mxu0 }
 0x2b8   : > { %v851_v47 = vadd.f32 %v850_v43, %v785_v34 }
 0x2ba   : > { %v2991_v33 = vpop.f32.mrf.mxu2 }
 0x2bb   : > { %959 = vmax.xlane.f32.xlu2 %v2991_v33 }
 0x2bd   : > { %v853_v46 = vpop.f32.mrf.mxu1 }
 0x2bf   : > { %v788_v44 = vpop.f32.mrf.mxu0 }
 0x2c0   : > { %v854_v39 = vadd.f32 %v853_v46, %v788_v44 }
 0x2c2   : > { %v2994_v45 = vpop.f32.mrf.mxu2 }
 0x2c3   : > { %961 = vmax.xlane.f32.xlu0 %v2994_v45 }
 0x2c5   : > { %v856_v54 = vpop.f32.mrf.mxu1 }
 0x2c7   : > { %v791_v53 = vpop.f32.mrf.mxu0 }
 0x2c8   : > { %v857_v15 = vadd.f32 %v856_v54, %v791_v53 }
 0x2ca   : > { %v2997_v14 = vpop.f32.mrf.mxu2 }
 0x2cb   : > { %963 = vmax.xlane.f32.xlu2 %v2997_v14 }
 0x2cd   : > { %v859_v52 = vpop.f32.mrf.mxu1 }
 0x2cf   : > { %v794_v40 = vpop.f32.mrf.mxu0 }
 0x2d0   : > { %v860_v48 = vadd.f32 %v859_v52, %v794_v40 }
 0x2d2   : > { %v3009_v61 = vpop.f32.mrf.mxu2 }
 0x2d5   : > { %v862_v35 = vpop.f32.mrf.mxu1 }
 0x2d7   : > { %v797_v22 = vpop.f32.mrf.mxu0 }
 0x2d8   : > { %v863_v36 = vadd.f32 %v862_v35, %v797_v22 }
 0x2da   : > { %v3015_v16 = vpop.f32.mrf.mxu2 }
 0x2dd   : > { %v865_v0 = vpop.f32.mrf.mxu1 }
 0x2df   : > { %v800_v63 = vpop.f32.mrf.mxu0 }
 0x2e0   : > { %v866_v23 = vadd.f32 %v865_v0, %v800_v63 }
 0x2e2   : > { %1301 = vmatpush.msra.mxu3 %v866_v23  ;;  %v3022_v58 = vpop.f32.mrf.mxu2 }
 0x2e4   : > { %1302 = vmatpush.msra.mxu3 %v863_v36 }
 0x2e6   : > { %1303 = vmatpush.msra.mxu3 %v860_v48 }
 0x2e8   : > { %1304 = vmatpush.msra.mxu3 %v857_v15 }
 0x2ea   : > { %1305 = vmatpush.msra.mxu3 %v854_v39 }
 0x2ec   : > { %1306 = vmatpush.msra.mxu3 %v851_v47 }
 0x2ee   : > { %1307 = vmatpush.msra.mxu3 %v848_v10 }
 0x2f0   : > { %1308 = vmatpush.msra.mxu3 %v845_v49 }
 0x2f2   : > { %1309 = vmatpush.msra.mxu3 %v842_v11 }
 0x2f4   : > { %1310 = vmatpush.msra.mxu3 %v839_v38 }
 0x2f6   : > { %1311 = vmatpush.msra.mxu3 %v836_v37 }
 0x2f8   : > { %1312 = vmatpush.msra.mxu3 %v833_v41 }
 0x2fa   : > { %1313 = vmatpush.msra.mxu3 %v830_v8 }
 0x2fc   : > { %1314 = vmatpush.msra.mxu3 %v827_v9 }
 0x2fe   : > { %1315 = vmatpush.msra.mxu3 %v824_v18 }
 0x300   : > { %1316 = vmatpush.msra.mxu3 %v821_v13 }
 0x306   : > { %v950_v5 = vpop.xlane.xlu0 %949 }
 0x307   : > { %v981_v3 = vsub.f32 %v2976_v24, %v950_v5 }
 0x309   : > { %v997_v1 = vmul.f32 1.442695, %v981_v3 }
 0x30b   : > { %2055 = vpow2.f32 %v997_v1 }
 0x30e   : > { %v952_v2 = vpop.xlane.xlu0 %951 }
 0x30f   : > { %v982_v62 = vsub.f32 %v2979_v4, %v952_v2  ;;  %v3032_v4 = vpop.f32.mrf.mxu2 }
 0x311   : > { %v3012_v17 = vpop.eup %2055  ;;  %v999_v12 = vmul.f32 1.442695, %v982_v62 }
 0x312   : > { %1029 = vadd.xlane.f32.xlu1 %v3012_v17 }
 0x313   : > { %2057 = vpow2.f32 %v999_v12 }
 0x316   : > { %v954_v59 = vpop.xlane.xlu1 %953 }
 0x317   : > { %v983_v50 = vsub.f32 %v2982_v27, %v954_v59 }
 0x319   : > { %v3018_v7 = vpop.eup %2057  ;;  %v1001_v20 = vmul.f32 1.442695, %v983_v50 }
 0x31a   : > { %1031 = vadd.xlane.f32.xlu0 %v3018_v7  ;;  %965 = vmax.xlane.f32.xlu1 %v3009_v61 }
 0x31b   : > { %2059 = vpow2.f32 %v1001_v20 }
 0x31e   : > { %v956_v57 = vpop.xlane.xlu1 %955 }
 0x31f   : > { %v984_v55 = vsub.f32 %v2985_v42, %v956_v57  ;;  %v3041_v42 = vpop.f32.mrf.mxu2 }
 0x321   : > { %v3025_v21 = vpop.eup %2059  ;;  %v1003_v56 = vmul.f32 1.442695, %v984_v55 }
 0x322   : > { %1033 = vadd.xlane.f32.xlu2 %v3025_v21  ;;  %967 = vmax.xlane.f32.xlu0 %v3015_v16 }
 0x323   : > { %2061 = vpow2.f32 %v1003_v56 }
 0x326   : > { %v958_v24 = vpop.xlane.xlu2 %957 }
 0x327   : > { %v985_v60 = vsub.f32 %v2988_v51, %v958_v24  ;;  %v3048_v31 = vpop.f32.mrf.mxu2 }
 0x329   : > { %v3030_v25 = vpop.eup %2061  ;;  %v1005_v26 = vmul.f32 1.442695, %v985_v60 }
 0x32a   : > { %1035 = vadd.xlane.f32.xlu1 %v3030_v25  ;;  %969 = vmax.xlane.f32.xlu2 %v3022_v58 }
 0x32b   : > { %2063 = vpow2.f32 %v1005_v26 }
 0x32e   : > { %v960_v6 = vpop.xlane.xlu2 %959 }
 0x32f   : > { %v986_v27 = vsub.f32 %v2991_v33, %v960_v6 }
 0x331   : > { %v3037_v28 = vpop.eup %2063  ;;  %v1007_v19 = vmul.f32 1.442695, %v986_v27 }
 0x332   : > { %1037 = vadd.xlane.f32.xlu0 %v3037_v28  ;;  %971 = vmax.xlane.f32.xlu1 %v3032_v4 }
 0x333   : > { %2065 = vpow2.f32 %v1007_v19 }
 0x336   : > { %v962_v29 = vpop.xlane.xlu0 %961 }
 0x337   : > { %v987_v30 = vsub.f32 %v2994_v45, %v962_v29  ;;  %v3055_v45 = vpop.f32.mrf.mxu2 }
 0x339   : > { %v3044_v51 = vpop.eup %2065  ;;  %v1009_v49 = vmul.f32 1.442695, %v987_v30 }
 0x33a   : > { %1039 = vadd.xlane.f32.xlu2 %v3044_v51  ;;  %973 = vmax.xlane.f32.xlu0 %v3041_v42 }
 0x33b   : > { %2067 = vpow2.f32 %v1009_v49 }
 0x33e   : > { %v964_v32 = vpop.xlane.xlu2 %963 }
 0x33f   : > { %v988_v33 = vsub.f32 %v2997_v14, %v964_v32  ;;  %v3061_v46 = vpop.f32.mrf.mxu2 }
 0x341   : > { %v3051_v34 = vpop.eup %2067  ;;  %v1011_v43 = vmul.f32 1.442695, %v988_v33 }
 0x342   : > { %1041 = vadd.xlane.f32.xlu1 %v3051_v34  ;;  %975 = vmax.xlane.f32.xlu2 %v3048_v31 }
 0x343   : > { %2069 = vpow2.f32 %v1011_v43 }
 0x349   : > { %v3057_v44 = vpop.eup %2069 }
 0x34a   : > { %1043 = vadd.xlane.f32.xlu0 %v3057_v44  ;;  %977 = vmax.xlane.f32.xlu1 %v3055_v45 }
 0x352   : > { %979 = vmax.xlane.f32.xlu0 %v3061_v46 }
 0x385   : > { %v1030_v14 = vpop.xlane.xlu1 %1029 }
 0x386   : > { %2071 = vrcp.f32 %v1030_v14  ;;  %v1072_v63 = vand.u32 2147483648, %v1030_v14  ;;  %v1070_v23 = vand.u32 2147483647, %v1030_v14  ;;  %vm1066_vm1 = vweird.f32 %v1030_v14 }
 0x388   : > { %v1073_v39 = vor.u32 1.1754944e-38, %v1072_v63  ;;  %vm1071_vm3 = vcmp.eq.f32.partialorder %v1070_v23, 8.507059e+37 }
 0x38c   : > { %v2072_v53 = vpop.eup %2071 }
 0x38d   : > { %v1062_v54 = vmul.f32 %v2072_v53, %v1030_v14  ;;  %v1032_v40 = vpop.xlane.xlu0 %1031  ;;  %v966_v52 = vpop.xlane.xlu1 %965  ;;  %vm1067_vm0 = vweird.f32 %v2072_v53 }
 0x38e   : > { %2073 = vrcp.f32 %v1032_v40  ;;  %v989_v22 = vsub.f32 %v3009_v61, %v966_v52  ;;  %vm1068_vm2 = vmor %vm1066_vm1, %vm1067_vm0  ;;  %v1087_v3 = vand.u32 2147483648, %v1032_v40  ;;  %v1085_v1 = vand.u32 2147483647, %v1032_v40 }
 0x38f   : > { %v1063_v35 = vsub.f32 1.0, %v1062_v54  ;;  %vm1081_vm5 = vweird.f32 %v1032_v40 }
 0x390   : > { %v1013_v0 = vmul.f32 1.442695, %v989_v22  ;;  %v1088_v62 = vor.u32 1.1754944e-38, %v1087_v3  ;;  %vm1086_vm7 = vcmp.eq.f32.partialorder %v1085_v1, 8.507059e+37  ;;  %v1424_v1 = vld [vmem:[%s2565_s11 + $0xd0] sm:$0xff] }
 0x391   : > { %v1064_v36 = vmul.f32 %v2072_v53, %v1063_v35 }
 0x392   : > { %2075 = vpow2.f32 %v1013_v0 }
 0x393   : > { %v1065_v48 = vadd.f32 %v2072_v53, %v1064_v36 }
 0x394   : > { %v2074_v15 = vpop.eup %2073 }
 0x395   : > { %v1069_v47 = vsel %vm1068_vm2, %v2072_v53, %v1065_v48  ;;  %v1077_v10 = vmul.f32 %v2074_v15, %v1032_v40  ;;  %v1034_v11 = vpop.xlane.xlu2 %1033  ;;  %v968_v38 = vpop.xlane.xlu0 %967  ;;  %vm1082_vm4 = vweird.f32 %v2074_v15 }
 0x396   : > { %v1074_v37 = vsel %vm1071_vm3, %v1073_v39, %v1069_v47  ;;  %2077 = vrcp.f32 %v1034_v11  ;;  %v990_v8 = vsub.f32 %v3015_v16, %v968_v38  ;;  %vm1083_vm6 = vmor %vm1081_vm5, %vm1082_vm4  ;;  %v1102_v26 = vand.u32 2147483648, %v1034_v11 }
 0x397   : > { %v1078_v41 = vsub.f32 1.0, %v1077_v10  ;;  %v1075_v9 = vmul.f32 %v3012_v17, %v1074_v37  ;;  %v1100_v6 = vand.u32 2147483647, %v1034_v11  ;;  %vm1096_vm9 = vweird.f32 %v1034_v11 }
 0x398   : > { %v3067_v18 = vpop.eup %2075  ;;  %v1015_v13 = vmul.f32 1.442695, %v990_v8  ;;  %v1429_v8 = vld [vmem:[%s2565_s11 + $0xf8] sm:$0xff] }
 0x399   : > { %v1079_v5 = vmul.f32 %v2074_v15, %v1078_v41  ;;  %1317 = vmatmul.f32.vlgmr.msra.gmra.mxu3 %v1075_v9  ;;  %1045 = vadd.xlane.f32.xlu2 %v3067_v18  ;;  %vm1101_vm11 = vcmp.eq.f32.partialorder %v1100_v6, 8.507059e+37  ;;  %v1428_v41 = vld [vmem:[%s2565_s11 + $0xf0] sm:$0xff]  ;;  %v1426_v9 = vld [vmem:[%s2565_s11 + $0xe0] sm:$0xff] }
 0x39a   : > { %2079 = vpow2.f32 %v1015_v13  ;;  %1430 = vmatpush.msra.mxu0 %v1428_v41  ;;  %1495 = vmatpush.msra.mxu1 %v1429_v8  ;;  %v1420_v6 = vld [vmem:[%s2565_s11 + $0xb0] sm:$0xff] }
 0x39b   : > { %v1080_v61 = vadd.f32 %v2074_v15, %v1079_v5 }
 0x39c   : > { %v2078_v2 = vpop.eup %2077  ;;  %1431 = vmatpush.msra.mxu0 %v1426_v9 }
 0x39d   : > { %v1092_v12 = vmul.f32 %v2078_v2, %v1034_v11  ;;  %v1036_v16 = vpop.xlane.xlu1 %1035  ;;  %v970_v59 = vpop.xlane.xlu2 %969  ;;  %v1084_v17 = vsel %vm1083_vm6, %v2074_v15, %v1080_v61  ;;  %vm1097_vm8 = vweird.f32 %v2078_v2  ;;  %v1425_v61 = vld [vmem:[%s2565_s11 + $0xd8] sm:$0xff] }
 0x39e   : > { %2081 = vrcp.f32 %v1036_v16  ;;  %v991_v50 = vsub.f32 %v3022_v58, %v970_v59  ;;  %v1089_v57 = vsel %vm1086_vm7, %v1088_v62, %v1084_v17  ;;  %vm1098_vm10 = vmor %vm1096_vm9, %vm1097_vm8  ;;  %v1103_v58 = vor.u32 1.1754944e-38, %v1102_v26  ;;  %1432 = vmatpush.msra.mxu0 %v1424_v1 }
 0x39f   : > { %v1093_v20 = vsub.f32 1.0, %v1092_v12  ;;  %v1090_v56 = vmul.f32 %v3018_v7, %v1089_v57  ;;  %v1117_v52 = vand.u32 2147483648, %v1036_v16  ;;  %v1115_v22 = vand.u32 2147483647, %v1036_v16 }
 0x3a0   : > { %v1017_v55 = vmul.f32 1.442695, %v991_v50  ;;  %v3072_v24 = vpop.eup %2079  ;;  %vm1111_vm13 = vweird.f32 %v1036_v16  ;;  %v1422_v50 = vld [vmem:[%s2565_s11 + $0xc0] sm:$0xff] }
 0x3a1   : > { %v1094_v60 = vmul.f32 %v2078_v2, %v1093_v20  ;;  %1320 = vmatmul.f32.gmra.mxu3 %v1090_v56  ;;  %1047 = vadd.xlane.f32.xlu1 %v3072_v24  ;;  %vm1116_vm15 = vcmp.eq.f32.partialorder %v1115_v22, 8.507059e+37 }
 0x3a2   : > { %2083 = vpow2.f32 %v1017_v55  ;;  %v1423_v55 = vld [vmem:[%s2565_s11 + $0xc8] sm:$0xff]  ;;  %1433 = vmatpush.msra.mxu0 %v1422_v50 }
 0x3a3   : > { %v1095_v27 = vadd.f32 %v2078_v2, %v1094_v60  ;;  %v1411_v50 = vld [vmem:[%s2565_s11 + $0x68] sm:$0xff] }
 0x3a4   : > { %v2082_v19 = vpop.eup %2081  ;;  %1434 = vmatpush.msra.mxu0 %v1420_v6  ;;  %v1402_v6 = vld [vmem:[%s2565_s11 + $0x20] sm:$0xff] }
 0x3a5   : > { %v1107_v29 = vmul.f32 %v2082_v19, %v1036_v16  ;;  %v3075_v30 = vpop.xlane.xlu0 %1037  ;;  %v972_v49 = vpop.xlane.xlu1 %971  ;;  %v1099_v7 = vsel %vm1098_vm10, %v2078_v2, %v1095_v27  ;;  %vm1112_vm12 = vweird.f32 %v2082_v19 }
 0x3a6   : > { %2085 = vrcp.f32 %v3075_v30  ;;  %v992_v32 = vsub.f32 %v3032_v4, %v972_v49  ;;  %v1104_v43 = vsel %vm1101_vm11, %v1103_v58, %v1099_v7  ;;  %vm1113_vm14 = vmor %vm1111_vm13, %vm1112_vm12  ;;  %v1118_v4 = vor.u32 1.1754944e-38, %v1117_v52  ;;  %v1417_v52 = vld [vmem:[%s2565_s11 + $0x98] sm:$0xff] }
 0x3a7   : > { %v1108_v33 = vsub.f32 1.0, %v1107_v29  ;;  %v1105_v54 = vmul.f32 %v3025_v21, %v1104_v43  ;;  %v1132_v37 = vand.u32 2147483648, %v3075_v30  ;;  %vm1126_vm1 = vweird.f32 %v3075_v30  ;;  %v1418_v29 = vld [vmem:[%s2565_s11 + $0xa0] sm:$0xff] }
 0x3a8   : > { %v3079_v14 = vpop.eup %2083  ;;  %v1019_v53 = vmul.f32 1.442695, %v992_v32  ;;  %v1416_v32 = vld [vmem:[%s2565_s11 + $0x90] sm:$0xff]  ;;  %1435 = vmatpush.msra.mxu0 %v1418_v29  ;;  %v1399_v29 = vld [vmem:[%s2565_s11 + $0x8] sm:$0xff] }
 0x3a9   : > { %v1109_v40 = vmul.f32 %v2082_v19, %v1108_v33  ;;  %1049 = vadd.xlane.f32.xlu2 %v3079_v14  ;;  %1323 = vmatmul.f32.gmra.mxu3 %v1105_v54  ;;  %v1133_v2 = vor.u32 1.1754944e-38, %v1132_v37 }
 0x3aa   : > { %2087 = vpow2.f32 %v1019_v53  ;;  %1436 = vmatpush.msra.mxu0 %v1416_v32 }
 0x3ab   : > { %v1110_v35 = vadd.f32 %v2082_v19, %v1109_v40 }
 0x3ac   : > { %v2086_v63 = vpop.eup %2085 }
 0x3ad   : > { %v1122_v0 = vmul.f32 %v2086_v63, %v3075_v30  ;;  %v3084_v36 = vpop.xlane.xlu2 %1039  ;;  %v974_v23 = vpop.xlane.xlu0 %973  ;;  %v1114_v48 = vsel %vm1113_vm14, %v2082_v19, %v1110_v35  ;;  %vm1127_vm0 = vweird.f32 %v2086_v63  ;;  %v1414_v35 = vld [vmem:[%s2565_s11 + $0x80] sm:$0xff] }
 0x3ae   : > { %2089 = vrcp.f32 %v3084_v36  ;;  %v993_v21 = vsub.f32 %v3041_v42, %v974_v23  ;;  %v1119_v39 = vsel %vm1116_vm15, %v1118_v4, %v1114_v48  ;;  %v1130_v42 = vand.u32 2147483647, %v3075_v30  ;;  %vm3099_vm2 = vmor %vm1126_vm1, %vm1127_vm0  ;;  %v1419_v30 = vld [vmem:[%s2565_s11 + $0xa8] sm:$0xff]  ;;  %1437 = vmatpush.msra.mxu0 %v1414_v35 }
 0x3af   : > { %v1123_v15 = vsub.f32 1.0, %v1122_v0  ;;  %v1120_v11 = vmul.f32 %v3030_v25, %v1119_v39  ;;  %v1427_v25 = vld [vmem:[%s2565_s11 + $0xe8] sm:$0xff]  ;;  %v1147_v19 = vand.u32 2147483648, %v3084_v36  ;;  %v1145_v58 = vand.u32 2147483647, %v3084_v36 }
 0x3b0   : > { %v3088_v47 = vpop.eup %2087  ;;  %v1021_v10 = vmul.f32 1.442695, %v993_v21  ;;  %1496 = vmatpush.msra.mxu1 %v1427_v25  ;;  %vm1131_vm3 = vcmp.eq.f32.partialorder %v1130_v42, 8.507059e+37  ;;  %vm1141_vm5 = vweird.f32 %v3084_v36  ;;  %v1415_v0 = vld [vmem:[%s2565_s11 + $0x88] sm:$0xff] }
 0x3b1   : > { %v1124_v38 = vmul.f32 %v2086_v63, %v1123_v15  ;;  %1051 = vadd.xlane.f32.xlu0 %v3088_v47  ;;  %1326 = vmatmul.f32.gmra.mxu3 %v1120_v11  ;;  %v1148_v33 = vor.u32 1.1754944e-38, %v1147_v19  ;;  %vm1146_vm7 = vcmp.eq.f32.partialorder %v1145_v58, 8.507059e+37  ;;  %v1400_v19 = vld [vmem:[%s2565_s11 + $0x10] sm:$0xff]  ;;  %v1398_v58 = vld [vmem:[%s2565_s11] sm:$0xff] }
 0x3b2   : > { %2091 = vpow2.f32 %v1021_v10  ;;  %1497 = vmatpush.msra.mxu1 %v1425_v61 }
 0x3b3   : > { %v1125_v5 = vadd.f32 %v2086_v63, %v1124_v38 }
 0x3b4   : > { %v2090_v3 = vpop.eup %2089  ;;  %1498 = vmatpush.msra.mxu1 %v1423_v55  ;;  %v1407_v55 = vld [vmem:[%s2565_s11 + $0x48] sm:$0xff] }
 0x3b5   : > { %v1137_v62 = vmul.f32 %v2090_v3, %v3084_v36  ;;  %v3106_v12 = vpop.xlane.xlu1 %1041  ;;  %v976_v16 = vpop.xlane.xlu2 %975  ;;  %v1129_v59 = vsel %vm3099_vm2, %v2086_v63, %v1125_v5  ;;  %vm1142_vm4 = vweird.f32 %v2090_v3 }
 0x3b6   : > { %2093 = vrcp.f32 %v3106_v12  ;;  %v994_v17 = vsub.f32 %v3048_v31, %v976_v16  ;;  %v1134_v57 = vsel %vm1131_vm3, %v1133_v2, %v1129_v59  ;;  %v1421_v31 = vld [vmem:[%s2565_s11 + $0xb8] sm:$0xff]  ;;  %vm3125_vm6 = vmor %vm1141_vm5, %vm1142_vm4  ;;  %v1162_v23 = vand.u32 2147483648, %v3106_v12  ;;  %v1412_v16 = vld [vmem:[%s2565_s11 + $0x70] sm:$0xff] }
 0x3b7   : > { %v1138_v20 = vsub.f32 1.0, %v1137_v62  ;;  %v1135_v26 = vmul.f32 %v3037_v28, %v1134_v57  ;;  %1499 = vmatpush.msra.mxu1 %v1421_v31  ;;  %vm1156_vm9 = vweird.f32 %v3106_v12  ;;  %v1413_v59 = vld [vmem:[%s2565_s11 + $0x78] sm:$0xff]  ;;  %1438 = vmatpush.msra.mxu0 %v1412_v16  ;;  %v1406_v57 = vld [vmem:[%s2565_s11 + $0x40] sm:$0xff] }
 0x3b8   : > { %v3114_v56 = vpop.eup %2091  ;;  %v1023_v60 = vmul.f32 1.442695, %v994_v17  ;;  %v1163_v11 = vor.u32 1.1754944e-38, %v1162_v23  ;;  %v1410_v17 = vld [vmem:[%s2565_s11 + $0x60] sm:$0xff]  ;;  %v1401_v31 = vld [vmem:[%s2565_s11 + $0x18] sm:$0xff] }
 0x3b9   : > { %v1139_v27 = vmul.f32 %v2090_v3, %v1138_v20  ;;  %1053 = vadd.xlane.f32.xlu1 %v3114_v56  ;;  %1329 = vmatmul.f32.gmra.mxu3 %v1135_v26  ;;  %v1409_v20 = vld [vmem:[%s2565_s11 + $0x58] sm:$0xff] }
 0x3ba   : > { %2095 = vpow2.f32 %v1023_v60  ;;  %1500 = vmatpush.msra.mxu1 %v1419_v30  ;;  %1439 = vmatpush.msra.mxu0 %v1410_v17  ;;  %v1404_v60 = vld [vmem:[%s2565_s11 + $0x30] sm:$0xff]  ;;  %v1405_v26 = vld [vmem:[%s2565_s11 + $0x38] sm:$0xff] }
 0x3bb   : > { %v1140_v28 = vadd.f32 %v2090_v3, %v1139_v27  ;;  %v1403_v27 = vld [vmem:[%s2565_s11 + $0x28] sm:$0xff] }
 0x3bc   : > { %v2094_v49 = vpop.eup %2093  ;;  %1501 = vmatpush.msra.mxu1 %v1417_v52 }
 0x3bd   : > { %v1152_v43 = vmul.f32 %v2094_v49, %v3106_v12  ;;  %v1044_v53 = vpop.xlane.xlu0 %1043  ;;  %v978_v54 = vpop.xlane.xlu1 %977  ;;  %v1144_v40 = vsel %vm3125_vm6, %v2090_v3, %v1140_v28  ;;  %vm1157_vm8 = vweird.f32 %v2094_v49 }
 0x3be   : > { %2097 = vrcp.f32 %v1044_v53  ;;  %v995_v22 = vsub.f32 %v3055_v45, %v978_v54  ;;  %v1149_v4 = vsel %vm1146_vm7, %v1148_v33, %v1144_v40  ;;  %v1160_v45 = vand.u32 2147483647, %v3106_v12  ;;  %1502 = vmatpush.msra.mxu1 %v1415_v0  ;;  %vm1158_vm10 = vmor %vm1156_vm9, %vm1157_vm8 }
 0x3bf   : > { %v1153_v63 = vsub.f32 1.0, %v1152_v43  ;;  %v1150_v21 = vmul.f32 %v3044_v51, %v1149_v4  ;;  %v1177_v25 = vand.u32 2147483648, %v1044_v53  ;;  %v1175_v1 = vand.u32 2147483647, %v1044_v53 }
 0x3c0   : > { %v3137_v36 = vpop.eup %2095  ;;  %v1025_v48 = vmul.f32 1.442695, %v995_v22  ;;  %vm1161_vm11 = vcmp.eq.f32.partialorder %v1160_v45, 8.507059e+37  ;;  %vm1171_vm13 = vweird.f32 %v1044_v53  ;;  %1503 = vmatpush.msra.mxu1 %v1413_v59 }
 0x3c1   : > { %v1154_v15 = vmul.f32 %v2094_v49, %v1153_v63  ;;  %1055 = vadd.xlane.f32.xlu2 %v3137_v36  ;;  %1332 = vmatmul.f32.gmra.mxu3 %v1150_v21  ;;  %v1178_v61 = vor.u32 1.1754944e-38, %v1177_v25  ;;  %vm1176_vm15 = vcmp.eq.f32.partialorder %v1175_v1, 8.507059e+37 }
 0x3c2   : > { %2099 = vpow2.f32 %v1025_v48  ;;  %1504 = vmatpush.msra.mxu1 %v1411_v50 }
 0x3c3   : > { %v1155_v39 = vadd.f32 %v2094_v49, %v1154_v15 }
 0x3c4   : > { %v2098_v10 = vpop.eup %2097  ;;  %1505 = vmatpush.msra.mxu1 %v1409_v20 }
 0x3c5   : > { %v1167_v38 = vmul.f32 %v2098_v10, %v1044_v53  ;;  %v980_v37 = vpop.xlane.xlu0 %979  ;;  %v1159_v51 = vsel %vm1158_vm10, %v2094_v49, %v1155_v39  ;;  %vm1172_vm12 = vweird.f32 %v2098_v10 }
 0x3c6   : > { %v996_v42 = vsub.f32 %v3061_v46, %v980_v37  ;;  %v1164_v41 = vsel %vm1161_vm11, %v1163_v11, %v1159_v51  ;;  %vm1173_vm14 = vmor %vm1171_vm13, %vm1172_vm12  ;;  %1506 = vmatpush.msra.mxu1 %v1407_v55 }
 0x3c7   : > { %v1168_v8 = vsub.f32 1.0, %v1167_v38  ;;  %v1165_v9 = vmul.f32 %v3051_v34, %v1164_v41 }
 0x3c8   : > { %v3146_v5 = vpop.eup %2099  ;;  %v1027_v3 = vmul.f32 1.442695, %v996_v42  ;;  %1507 = vmatpush.msra.mxu1 %v1405_v26 }
 0x3c9   : > { %v1169_v13 = vmul.f32 %v2098_v10, %v1168_v8  ;;  %1057 = vadd.xlane.f32.xlu0 %v3146_v5  ;;  %1335 = vmatmul.f32.gmra.mxu3 %v1165_v9 }
 0x3ca   : > { %2101 = vpow2.f32 %v1027_v3  ;;  %1508 = vmatpush.msra.mxu1 %v1403_v27 }
 0x3cb   : > { %v1170_v46 = vadd.f32 %v2098_v10, %v1169_v13 }
 0x3cc   : > { %1509 = vmatpush.msra.mxu1 %v1401_v31 }
 0x3cd   : > { %v1174_v34 = vsel %vm1173_vm14, %v2098_v10, %v1170_v46 }
 0x3ce   : > { %v1179_v2 = vsel %vm1176_vm15, %v1178_v61, %v1174_v34  ;;  %1510 = vmatpush.msra.mxu1 %v1399_v29 }
 0x3cf   : > { %v1180_v62 = vmul.f32 %v3057_v44, %v1179_v2  ;;  %v1408_v44 = vld [vmem:[%s2565_s11 + $0x50] sm:$0xff] }
 0x3d0   : > { %v3150_v12 = vpop.eup %2101  ;;  %1440 = vmatpush.msra.mxu0 %v1408_v44 }
 0x3d1   : > { %1059 = vadd.xlane.f32.xlu1 %v3150_v12  ;;  %1338 = vmatmul.f32.gmra.mxu3 %v1180_v62 }
 0x3d2   : > { %1441 = vmatpush.msra.mxu0 %v1406_v57 }
 0x3d4   : > { %1442 = vmatpush.msra.mxu0 %v1404_v60 }
 0x3d6   : > { %1443 = vmatpush.msra.mxu0 %v1402_v6 }
 0x3d8   : > { %1444 = vmatpush.msra.mxu0 %v1400_v19 }
 0x3da   : > { %1445 = vmatpush.msra.mxu0 %v1398_v58 }
 0x40c   : > { %v1046_v28 = vpop.xlane.xlu2 %1045 }
 0x40d   : > { %2103 = vrcp.f32 %v1046_v28  ;;  %v1192_v43 = vand.u32 2147483648, %v1046_v28  ;;  %v1190_v53 = vand.u32 2147483647, %v1046_v28  ;;  %vm1186_vm1 = vweird.f32 %v1046_v28 }
 0x40f   : > { %v1193_v52 = vor.u32 1.1754944e-38, %v1192_v43  ;;  %vm1191_vm3 = vcmp.eq.f32.partialorder %v1190_v53, 8.507059e+37 }
 0x413   : > { %v2104_v30 = vpop.eup %2103 }
 0x414   : > { %v1182_v49 = vmul.f32 %v2104_v30, %v1046_v28  ;;  %v1048_v7 = vpop.xlane.xlu1 %1047  ;;  %vm1187_vm0 = vweird.f32 %v2104_v30 }
 0x415   : > { %2105 = vrcp.f32 %v1048_v7  ;;  %vm1188_vm2 = vmor %vm1186_vm1, %vm1187_vm0  ;;  %v1207_v21 = vand.u32 2147483648, %v1048_v7  ;;  %v1205_v45 = vand.u32 2147483647, %v1048_v7  ;;  %vm1201_vm5 = vweird.f32 %v1048_v7 }
 0x416   : > { %v1183_v32 = vsub.f32 1.0, %v1182_v49 }
 0x417   : > { %v1208_v11 = vor.u32 1.1754944e-38, %v1207_v21  ;;  %vm1206_vm7 = vcmp.eq.f32.partialorder %v1205_v45, 8.507059e+37 }
 0x418   : > { %v1184_v33 = vmul.f32 %v2104_v30, %v1183_v32 }
 0x41a   : > { %v1185_v54 = vadd.f32 %v2104_v30, %v1184_v33 }
 0x41b   : > { %v2106_v40 = vpop.eup %2105 }
 0x41c   : > { %v1318_v22 = vpop.f32.mrf.mxu3  ;;  %v1050_v35 = vpop.xlane.xlu2 %1049  ;;  %v1189_v63 = vsel %vm1188_vm2, %v2104_v30, %v1185_v54  ;;  %v1197_v4 = vmul.f32 %v2106_v40, %v1048_v7  ;;  %vm1202_vm4 = vweird.f32 %v2106_v40 }
 0x41d   : > { %2107 = vrcp.f32 %v1050_v35  ;;  %1446 = vmatmul.f32.vlgmr.msra.gmra.mxu0 %v1318_v22  ;;  %1511 = vmatmul.f32.vlgmr.msra.gmra.mxu1 %v1318_v22  ;;  %v1194_v0 = vsel %vm1191_vm3, %v1193_v52, %v1189_v63  ;;  %vm1203_vm6 = vmor %vm1201_vm5, %vm1202_vm4  ;;  %v1222_v8 = vand.u32 2147483648, %v1050_v35  ;;  %v1220_v3 = vand.u32 2147483647, %v1050_v35 }
 0x41e   : > { %v1198_v23 = vsub.f32 1.0, %v1197_v4  ;;  %v1195_v48 = vmul.f32 %v3067_v18, %v1194_v0  ;;  %vm1216_vm9 = vweird.f32 %v1050_v35 }
 0x41f   : > { %v1223_v46 = vor.u32 1.1754944e-38, %v1222_v8  ;;  %vm1221_vm11 = vcmp.eq.f32.partialorder %v1220_v3, 8.507059e+37 }
 0x420   : > { %v1199_v15 = vmul.f32 %v2106_v40, %v1198_v23  ;;  %1341 = vmatmul.f32.gmra.mxu3 %v1195_v48 }
 0x422   : > { %v1200_v10 = vadd.f32 %v2106_v40, %v1199_v15 }
 0x423   : > { %v2108_v39 = vpop.eup %2107 }
 0x424   : > { %v1212_v38 = vmul.f32 %v2108_v39, %v1050_v35  ;;  %v1052_v37 = vpop.xlane.xlu0 %1051  ;;  %v1321_v51 = vpop.f32.mrf.mxu3  ;;  %v1204_v42 = vsel %vm1203_vm6, %v2106_v40, %v1200_v10  ;;  %vm1217_vm8 = vweird.f32 %v2108_v39 }
 0x425   : > { %2109 = vrcp.f32 %v1052_v37  ;;  %1449 = vmatmul.f32.gmra.mxu0 %v1321_v51  ;;  %1514 = vmatmul.f32.gmra.mxu1 %v1321_v51  ;;  %v1209_v18 = vsel %vm1206_vm7, %v1208_v11, %v1204_v42  ;;  %vm1218_vm10 = vmor %vm1216_vm9, %vm1217_vm8  ;;  %v1237_v50 = vand.u32 2147483648, %v1052_v37  ;;  %v1235_v44 = vand.u32 2147483647, %v1052_v37 }
 0x426   : > { %v1213_v41 = vsub.f32 1.0, %v1212_v38  ;;  %v1210_v9 = vmul.f32 %v3072_v24, %v1209_v18  ;;  %vm1231_vm13 = vweird.f32 %v1052_v37 }
 0x427   : > { %v1238_v55 = vor.u32 1.1754944e-38, %v1237_v50  ;;  %vm1236_vm15 = vcmp.eq.f32.partialorder %v1235_v44, 8.507059e+37 }
 0x428   : > { %v1214_v25 = vmul.f32 %v2108_v39, %v1213_v41  ;;  %1344 = vmatmul.f32.gmra.mxu3 %v1210_v9 }
 0x42a   : > { %v1215_v13 = vadd.f32 %v2108_v39, %v1214_v25 }
 0x42b   : > { %v2110_v1 = vpop.eup %2109 }
 0x42c   : > { %v1227_v61 = vmul.f32 %v2110_v1, %v1052_v37  ;;  %v1054_v34 = vpop.xlane.xlu1 %1053  ;;  %v1219_v2 = vsel %vm1218_vm10, %v2108_v39, %v1215_v13  ;;  %v1324_v62 = vpop.f32.mrf.mxu3  ;;  %vm1232_vm12 = vweird.f32 %v2110_v1 }
 0x42d   : > { %2111 = vrcp.f32 %v1054_v34  ;;  %v1224_v16 = vsel %vm1221_vm11, %v1223_v46, %v1219_v2  ;;  %1452 = vmatmul.f32.gmra.mxu0 %v1324_v62  ;;  %1517 = vmatmul.f32.gmra.mxu1 %v1324_v62  ;;  %vm1233_vm14 = vmor %vm1231_vm13, %vm1232_vm12  ;;  %v1252_v29 = vand.u32 2147483648, %v1054_v34  ;;  %v1250_v28 = vand.u32 2147483647, %v1054_v34 }
 0x42e   : > { %v1228_v59 = vsub.f32 1.0, %v1227_v61  ;;  %v1225_v24 = vmul.f32 %v3079_v14, %v1224_v16  ;;  %vm1246_vm1 = vweird.f32 %v1054_v34 }
 0x42f   : > { %v1253_v7 = vor.u32 1.1754944e-38, %v1252_v29  ;;  %vm1251_vm3 = vcmp.eq.f32.partialorder %v1250_v28, 8.507059e+37 }
 0x430   : > { %v1229_v17 = vmul.f32 %v2110_v1, %v1228_v59  ;;  %1347 = vmatmul.f32.gmra.mxu3 %v1225_v24  ;;  %v1366_v59 = vld [vmem:[#allocation2 + $0xb0] sm:$0xff] }
 0x432   : > { %v1230_v20 = vadd.f32 %v2110_v1, %v1229_v17 }
 0x433   : > { %v2112_v57 = vpop.eup %2111 }
 0x434   : > { %v1242_v60 = vmul.f32 %v2112_v57, %v1054_v34  ;;  %v1056_v26 = vpop.xlane.xlu2 %1055  ;;  %v1234_v6 = vsel %vm1233_vm14, %v2110_v1, %v1230_v20  ;;  %v1327_v27 = vpop.f32.mrf.mxu3  ;;  %vm1247_vm0 = vweird.f32 %v2112_v57  ;;  %v1368_v20 = vld [vmem:[#allocation2 + $0xd8] sm:$0xff] }
 0x435   : > { %2113 = vrcp.f32 %v1056_v26  ;;  %1455 = vmatmul.f32.gmra.mxu0 %v1327_v27  ;;  %1520 = vmatmul.f32.gmra.mxu1 %v1327_v27  ;;  %v1239_v14 = vsel %vm1236_vm15, %v1238_v55, %v1234_v6  ;;  %vm1248_vm2 = vmor %vm1246_vm1, %vm1247_vm0  ;;  %v1267_v22 = vand.u32 2147483648, %v1056_v26  ;;  %v1265_v35 = vand.u32 2147483647, %v1056_v26 }
 0x436   : > { %v1243_v19 = vsub.f32 1.0, %v1242_v60  ;;  %v1240_v31 = vmul.f32 %v3088_v47, %v1239_v14  ;;  %vm1261_vm5 = vweird.f32 %v1056_v26 }
 0x437   : > { %v1268_v0 = vor.u32 1.1754944e-38, %v1267_v22  ;;  %vm1266_vm7 = vcmp.eq.f32.partialorder %v1265_v35, 8.507059e+37 }
 0x438   : > { %v1244_v58 = vmul.f32 %v2112_v57, %v1243_v19  ;;  %1350 = vmatmul.f32.gmra.mxu3 %v1240_v31  ;;  %v1371_v19 = vld [vmem:[#allocation2 + $0x68] sm:$0xff] }
 0x43a   : > { %v1245_v30 = vadd.f32 %v2112_v57, %v1244_v58 }
 0x43b   : > { %v2114_v49 = vpop.eup %2113 }
 0x43c   : > { %v1257_v32 = vmul.f32 %v2114_v49, %v1056_v26  ;;  %v1058_v33 = vpop.xlane.xlu0 %1057  ;;  %v1249_v43 = vsel %vm1248_vm2, %v2112_v57, %v1245_v30  ;;  %v1330_v53 = vpop.f32.mrf.mxu3  ;;  %vm1262_vm4 = vweird.f32 %v2114_v49  ;;  %v1369_v57 = vld [vmem:[#allocation2 + $0x18] sm:$0xff]  ;;  %v1372_v30 = vld [vmem:[#allocation2 + $0x30] sm:$0xff] }
 0x43d   : > { %2115 = vrcp.f32 %v1058_v33  ;;  %1458 = vmatmul.f32.gmra.mxu0 %v1330_v53  ;;  %1523 = vmatmul.f32.gmra.mxu1 %v1330_v53  ;;  %v1254_v47 = vsel %vm1251_vm3, %v1253_v7, %v1249_v43  ;;  %vm1263_vm6 = vmor %vm1261_vm5, %vm1262_vm4  ;;  %v1282_v39 = vand.u32 2147483648, %v1058_v33  ;;  %v1280_v38 = vand.u32 2147483647, %v1058_v33 }
 0x43e   : > { %v1258_v54 = vsub.f32 1.0, %v1257_v32  ;;  %v1255_v40 = vmul.f32 %v3114_v56, %v1254_v47  ;;  %vm1276_vm9 = vweird.f32 %v1058_v33  ;;  %v1375_v47 = vld [vmem:[#allocation2 + $0x88] sm:$0xff] }
 0x43f   : > { %v1283_v42 = vor.u32 1.1754944e-38, %v1282_v39  ;;  %vm1281_vm11 = vcmp.eq.f32.partialorder %v1280_v38, 8.507059e+37  ;;  %v1379_v39 = vld [vmem:[#allocation2 + $0xf0] sm:$0xff] }
 0x440   : > { %v1259_v52 = vmul.f32 %v2114_v49, %v1258_v54  ;;  %1353 = vmatmul.f32.gmra.mxu3 %v1255_v40  ;;  %v1374_v54 = vld [vmem:[#allocation2 + $0x80] sm:$0xff] }
 0x442   : > { %v1260_v63 = vadd.f32 %v2114_v49, %v1259_v52 }
 0x443   : > { %v2116_v4 = vpop.eup %2115 }
 0x444   : > { %v1272_v23 = vmul.f32 %v2116_v4, %v1058_v33  ;;  %v1060_v48 = vpop.xlane.xlu1 %1059  ;;  %v1264_v21 = vsel %vm1263_vm6, %v2114_v49, %v1260_v63  ;;  %v1333_v15 = vpop.f32.mrf.mxu3  ;;  %vm1277_vm8 = vweird.f32 %v2116_v4  ;;  %v1373_v49 = vld [vmem:[#allocation2 + $0x48] sm:$0xff] }
 0x445   : > { %2117 = vrcp.f32 %v1060_v48  ;;  %1461 = vmatmul.f32.gmra.mxu0 %v1333_v15  ;;  %1526 = vmatmul.f32.gmra.mxu1 %v1333_v15  ;;  %v1269_v56 = vsel %vm1266_vm7, %v1268_v0, %v1264_v21  ;;  %vm1278_vm10 = vmor %vm1276_vm9, %vm1277_vm8  ;;  %v1295_v1 = vand.u32 2147483647, %v1060_v48  ;;  %vm1291_vm13 = vweird.f32 %v1060_v48  ;;  %v1377_v0 = vld [vmem:[#allocation2 + $0xb8] sm:$0xff] }
 0x446   : > { %v1273_v45 = vsub.f32 1.0, %v1272_v23  ;;  %v1270_v10 = vmul.f32 %v3137_v36, %v1269_v56  ;;  %v1297_v36 = vand.u32 2147483648, %v1060_v48  ;;  %v1378_v56 = vld [vmem:[#allocation2 + $0x60] sm:$0xff] }
 0x447   : > { %vm1296_vm15 = vcmp.eq.f32.partialorder %v1295_v1, 8.507059e+37  ;;  %v1383_v1 = vld [vmem:[#allocation2 + $0x58] sm:$0xff] }
 0x448   : > { %v1274_v11 = vmul.f32 %v2116_v4, %v1273_v45  ;;  %1356 = vmatmul.f32.gmra.mxu3 %v1270_v10  ;;  %v1298_v61 = vor.u32 1.1754944e-38, %v1297_v36 }
 0x44a   : > { %v1275_v37 = vadd.f32 %v2116_v4, %v1274_v11 }
 0x44b   : > { %v2118_v51 = vpop.eup %2117 }
 0x44c   : > { %v1287_v41 = vmul.f32 %v2118_v51, %v1060_v48  ;;  %v1279_v18 = vsel %vm1278_vm10, %v2116_v4, %v1275_v37  ;;  %v1336_v8 = vpop.f32.mrf.mxu3  ;;  %vm1292_vm12 = vweird.f32 %v2118_v51  ;;  %v1376_v4 = vld [vmem:[#allocation2 + $0xe8] sm:$0xff] }
 0x44d   : > { %v1284_v9 = vsel %vm1281_vm11, %v1283_v42, %v1279_v18  ;;  %1464 = vmatmul.f32.gmra.mxu0 %v1336_v8  ;;  %1529 = vmatmul.f32.gmra.mxu1 %v1336_v8  ;;  %vm1293_vm14 = vmor %vm1291_vm13, %vm1292_vm12  ;;  %v1380_v42 = vld [vmem:[#allocation2 + $0x8] sm:$0xff] }
 0x44e   : > { %v1288_v25 = vsub.f32 1.0, %v1287_v41  ;;  %v1285_v3 = vmul.f32 %v3146_v5, %v1284_v9  ;;  %v1367_v5 = vld [vmem:[#allocation2] sm:$0xff]  ;;  %v1381_v41 = vld [vmem:[#allocation2 + $0x78] sm:$0xff] }
 0x450   : > { %v1289_v13 = vmul.f32 %v2118_v51, %v1288_v25  ;;  %1359 = vmatmul.f32.gmra.mxu3 %v1285_v3 }
 0x452   : > { %v1290_v46 = vadd.f32 %v2118_v51, %v1289_v13  ;;  %v1382_v13 = vld [vmem:[#allocation2 + $0x38] sm:$0xff] }
 0x454   : > { %v1294_v34 = vsel %vm1293_vm14, %v2118_v51, %v1290_v46  ;;  %v1339_v2 = vpop.f32.mrf.mxu3 }
 0x455   : > { %v1299_v62 = vsel %vm1296_vm15, %v1298_v61, %v1294_v34  ;;  %1467 = vmatmul.f32.gmra.mxu0 %v1339_v2  ;;  %1532 = vmatmul.f32.gmra.mxu1 %v1339_v2 }
 0x456   : > { %v1300_v16 = vmul.f32 %v3150_v12, %v1299_v62  ;;  %v1370_v12 = vld [vmem:[#allocation2 + $0x50] sm:$0xff]  ;;  %v1384_v62 = vld [vmem:[#allocation2 + $0x40] sm:$0xff] }
 0x458   : > { %1362 = vmatmul.f32.gmra.mxu3 %v1300_v16  ;;  %v1385_v16 = vld [vmem:[#allocation2 + $0xc8] sm:$0xff] }
 0x49a   : > { %v1447_v24 = vpop.f32.mrf.mxu0  ;;  %v1512_v17 = vpop.f32.mrf.mxu1 }
 0x49b   : > { %v1560_v50 = vadd.f32 %v1447_v24, %v1366_v59  ;;  %v1561_v44 = vadd.f32 %v1512_v17, %v1367_v5 }
 0x49d   : > { %1592 = vst [vmem:[#allocation2 + $0xb0] sm:$0xff] %v1560_v50  ;;  %v1386_v50 = vld [vmem:[#allocation2 + $0xe0] sm:$0xff] }
 0x49e   : > { %1593 = vst [vmem:[#allocation2] sm:$0xff] %v1561_v44  ;;  %v1387_v44 = vld [vmem:[#allocation2 + $0x90] sm:$0xff] }
 0x4a2   : > { %v1450_v55 = vpop.f32.mrf.mxu0  ;;  %v1515_v60 = vpop.f32.mrf.mxu1 }
 0x4a3   : > { %v1562_v26 = vadd.f32 %v1450_v55, %v1368_v20  ;;  %v1563_v6 = vadd.f32 %v1515_v60, %v1369_v57  ;;  %v1342_v27 = vpop.f32.mrf.mxu3 }
 0x4a4   : > { %1470 = vmatmul.f32.gmra.mxu0 %v1342_v27  ;;  %1535 = vmatmul.f32.gmra.mxu1 %v1342_v27 }
 0x4a5   : > { %1594 = vst [vmem:[#allocation2 + $0xd8] sm:$0xff] %v1562_v26  ;;  %v1388_v26 = vld [vmem:[#allocation2 + $0x70] sm:$0xff] }
 0x4a6   : > { %1595 = vst [vmem:[#allocation2 + $0x18] sm:$0xff] %v1563_v6  ;;  %v1389_v6 = vld [vmem:[#allocation2 + $0xc0] sm:$0xff] }
 0x4aa   : > { %v1453_v14 = vpop.f32.mrf.mxu0  ;;  %v1518_v31 = vpop.f32.mrf.mxu1 }
 0x4ab   : > { %v1564_v58 = vadd.f32 %v1453_v14, %v1370_v12  ;;  %v1565_v29 = vadd.f32 %v1518_v31, %v1371_v19  ;;  %v1345_v28 = vpop.f32.mrf.mxu3  ;;  %v1390_v31 = vld [vmem:[#allocation2 + $0xa8] sm:$0xff] }
 0x4ac   : > { %1473 = vmatmul.f32.gmra.mxu0 %v1345_v28  ;;  %1538 = vmatmul.f32.gmra.mxu1 %v1345_v28 }
 0x4ad   : > { %1596 = vst [vmem:[#allocation2 + $0x50] sm:$0xff] %v1564_v58  ;;  %v1391_v58 = vld [vmem:[#allocation2 + $0xd0] sm:$0xff] }
 0x4ae   : > { %1597 = vst [vmem:[#allocation2 + $0x68] sm:$0xff] %v1565_v29 }
 0x4b2   : > { %v1456_v7 = vpop.f32.mrf.mxu0  ;;  %v1521_v32 = vpop.f32.mrf.mxu1 }
 0x4b3   : > { %v1566_v33 = vadd.f32 %v1456_v7, %v1372_v30  ;;  %v1567_v43 = vadd.f32 %v1521_v32, %v1373_v49  ;;  %v1348_v53 = vpop.f32.mrf.mxu3  ;;  %v1392_v7 = vld [vmem:[#allocation2 + $0x10] sm:$0xff]  ;;  %v1393_v32 = vld [vmem:[#allocation2 + $0x28] sm:$0xff] }
 0x4b4   : > { %1476 = vmatmul.f32.gmra.mxu0 %v1348_v53  ;;  %1541 = vmatmul.f32.gmra.mxu1 %v1348_v53 }
 0x4b5   : > { %1598 = vst [vmem:[#allocation2 + $0x30] sm:$0xff] %v1566_v33 }
 0x4b6   : > { %1599 = vst [vmem:[#allocation2 + $0x48] sm:$0xff] %v1567_v43 }
 0x4ba   : > { %v1459_v40 = vpop.f32.mrf.mxu0  ;;  %v1524_v52 = vpop.f32.mrf.mxu1 }
 0x4bb   : > { %v1568_v22 = vadd.f32 %v1459_v40, %v1374_v54  ;;  %v1569_v35 = vadd.f32 %v1524_v52, %v1375_v47  ;;  %v1351_v63 = vpop.f32.mrf.mxu3  ;;  %v1394_v47 = vld [vmem:[#allocation2 + $0xa0] sm:$0xff]  ;;  %v1395_v40 = vld [vmem:[#allocation2 + $0xf8] sm:$0xff] }
 0x4bc   : > { %1479 = vmatmul.f32.gmra.mxu0 %v1351_v63  ;;  %1544 = vmatmul.f32.gmra.mxu1 %v1351_v63 }
 0x4bd   : > { %1600 = vst [vmem:[#allocation2 + $0x80] sm:$0xff] %v1568_v22 }
 0x4be   : > { %1601 = vst [vmem:[#allocation2 + $0x88] sm:$0xff] %v1569_v35 }
 0x4c2   : > { %v1462_v23 = vpop.f32.mrf.mxu0  ;;  %v1527_v48 = vpop.f32.mrf.mxu1 }
 0x4c3   : > { %v1570_v21 = vadd.f32 %v1462_v23, %v1376_v4  ;;  %v1571_v15 = vadd.f32 %v1527_v48, %v1377_v0  ;;  %v1354_v45 = vpop.f32.mrf.mxu3  ;;  %v1396_v4 = vld [vmem:[#allocation2 + $0x20] sm:$0xff]  ;;  %v1397_v0 = vld [vmem:[#allocation2 + $0x98] sm:$0xff] }
 0x4c4   : > { %1482 = vmatmul.f32.gmra.mxu0 %v1354_v45  ;;  %1547 = vmatmul.f32.gmra.mxu1 %v1354_v45 }
 0x4c5   : > { %1602 = vst [vmem:[#allocation2 + $0xe8] sm:$0xff] %v1570_v21 }
 0x4c6   : > { %1603 = vst [vmem:[#allocation2 + $0xb8] sm:$0xff] %v1571_v15 }
 0x4ca   : > { %v1465_v10 = vpop.f32.mrf.mxu0  ;;  %v1530_v11 = vpop.f32.mrf.mxu1 }
 0x4cb   : > { %v1572_v38 = vadd.f32 %v1465_v10, %v1378_v56  ;;  %v1573_v37 = vadd.f32 %v1530_v11, %v1379_v39  ;;  %v1357_v51 = vpop.f32.mrf.mxu3 }
 0x4cc   : > { %1485 = vmatmul.f32.gmra.mxu0 %v1357_v51  ;;  %1550 = vmatmul.f32.gmra.mxu1 %v1357_v51 }
 0x4cd   : > { %1604 = vst [vmem:[#allocation2 + $0x60] sm:$0xff] %v1572_v38 }
 0x4ce   : > { %1605 = vst [vmem:[#allocation2 + $0xf0] sm:$0xff] %v1573_v37 }
 0x4d2   : > { %v1468_v18 = vpop.f32.mrf.mxu0  ;;  %v1533_v8 = vpop.f32.mrf.mxu1 }
 0x4d3   : > { %v1574_v9 = vadd.f32 %v1468_v18, %v1380_v42  ;;  %v1575_v25 = vadd.f32 %v1533_v8, %v1381_v41  ;;  %v1360_v3 = vpop.f32.mrf.mxu3 }
 0x4d4   : > { %1488 = vmatmul.f32.gmra.mxu0 %v1360_v3  ;;  %1553 = vmatmul.f32.gmra.mxu1 %v1360_v3 }
 0x4d5   : > { %1606 = vst [vmem:[#allocation2 + $0x8] sm:$0xff] %v1574_v9 }
 0x4d6   : > { %1607 = vst [vmem:[#allocation2 + $0x78] sm:$0xff] %v1575_v25 }
 0x4db   : > { %v1363_v36 = vpop.f32.mrf.mxu3 }
 0x4dc   : > { %1491 = vmatmul.f32.gmra.mxu0 %v1363_v36  ;;  %1556 = vmatmul.f32.gmra.mxu1 %v1363_v36 }
 0x521   : > { %v1471_v46 = vpop.f32.mrf.mxu0  ;;  %v1536_v61 = vpop.f32.mrf.mxu1 }
 0x522   : > { %v1576_v34 = vadd.f32 %v1471_v46, %v1382_v13  ;;  %v1577_v2 = vadd.f32 %v1536_v61, %v1383_v1 }
 0x524   : > { %1608 = vst [vmem:[#allocation2 + $0x38] sm:$0xff] %v1576_v34 }
 0x525   : > { %1609 = vst [vmem:[#allocation2 + $0x58] sm:$0xff] %v1577_v2 }
 0x529   : > { %v1474_v59 = vpop.f32.mrf.mxu0  ;;  %v1539_v5 = vpop.f32.mrf.mxu1 }
 0x52a   : > { %v1578_v24 = vadd.f32 %v1474_v59, %v1384_v62  ;;  %v1579_v17 = vadd.f32 %v1539_v5, %v1385_v16 }
 0x52c   : > { %1610 = vst [vmem:[#allocation2 + $0x40] sm:$0xff] %v1578_v24 }
 0x52d   : > { %1611 = vst [vmem:[#allocation2 + $0xc8] sm:$0xff] %v1579_v17 }
 0x531   : > { %v1477_v20 = vpop.f32.mrf.mxu0  ;;  %v1542_v57 = vpop.f32.mrf.mxu1 }
 0x532   : > { %v1580_v55 = vadd.f32 %v1477_v20, %v1386_v50  ;;  %v1581_v60 = vadd.f32 %v1542_v57, %v1387_v44 }
 0x534   : > { %1612 = vst [vmem:[#allocation2 + $0xe0] sm:$0xff] %v1580_v55 }
 0x535   : > { %1613 = vst [vmem:[#allocation2 + $0x90] sm:$0xff] %v1581_v60 }
 0x539   : > { %v1480_v27 = vpop.f32.mrf.mxu0  ;;  %v1545_v12 = vpop.f32.mrf.mxu1 }
 0x53a   : > { %v1582_v19 = vadd.f32 %v1480_v27, %v1388_v26  ;;  %v1583_v14 = vadd.f32 %v1545_v12, %v1389_v6 }
 0x53c   : > { %1614 = vst [vmem:[#allocation2 + $0x70] sm:$0xff] %v1582_v19 }
 0x53d   : > { %1615 = vst [vmem:[#allocation2 + $0xc0] sm:$0xff] %v1583_v14 }
 0x541   : > { %v1483_v29 = vpop.f32.mrf.mxu0  ;;  %v1548_v28 = vpop.f32.mrf.mxu1 }
 0x542   : > { %v1584_v30 = vadd.f32 %v1483_v29, %v1390_v31  ;;  %v1585_v49 = vadd.f32 %v1548_v28, %v1391_v58 }
 0x544   : > { %1616 = vst [vmem:[#allocation2 + $0xa8] sm:$0xff] %v1584_v30 }
 0x545   : > { %1617 = vst [vmem:[#allocation2 + $0xd0] sm:$0xff] %v1585_v49 }
 0x549   : > { %v1486_v33 = vpop.f32.mrf.mxu0  ;;  %v1551_v43 = vpop.f32.mrf.mxu1 }
 0x54a   : > { %v1586_v53 = vadd.f32 %v1486_v33, %v1392_v7  ;;  %v1587_v54 = vadd.f32 %v1551_v43, %v1393_v32 }
 0x54c   : > { %1618 = vst [vmem:[#allocation2 + $0x10] sm:$0xff] %v1586_v53 }
 0x54d   : > { %1619 = vst [vmem:[#allocation2 + $0x28] sm:$0xff] %v1587_v54 }
 0x551   : > { %v1489_v52 = vpop.f32.mrf.mxu0  ;;  %v1554_v22 = vpop.f32.mrf.mxu1 }
 0x552   : > { %v1588_v35 = vadd.f32 %v1489_v52, %v1394_v47  ;;  %v1589_v63 = vadd.f32 %v1554_v22, %v1395_v40 }
 0x554   : > { %1620 = vst [vmem:[#allocation2 + $0xa0] sm:$0xff] %v1588_v35 }
 0x555   : > { %1621 = vst [vmem:[#allocation2 + $0xf8] sm:$0xff] %v1589_v63 }
 0x559   : > { %v1492_v23 = vpop.f32.mrf.mxu0  ;;  %v1557_v48 = vpop.f32.mrf.mxu1  ;;  %1627 = sbr.rel (%p1890_p7) target bundleno = 1411 (0x583), region = 56 }
 0x55a   : > { %v1590_v21 = vadd.f32 %v1492_v23, %v1396_v4  ;;  %v1591_v15 = vadd.f32 %v1557_v48, %v1397_v0 }
 0x55c   : > { %1622 = vst [vmem:[#allocation2 + $0x20] sm:$0xff] %v1590_v21 }
 0x55d   : > { %1623 = vst [vmem:[#allocation2 + $0x98] sm:$0xff] %v1591_v15 }
 0x55e   : > { %v1628_v45 = vld [vmem:[#allocation2 + $0xb0] sm:$0xff]  ;;  %v1660_v56 = vld [vmem:[%s3396_s28] sm:$0x3]  ;;  %v1630_v38 = vld [vmem:[#allocation2 + $0xd8] sm:$0xff] }
 0x55f   : > { %v1629_v39 = vld [vmem:[#allocation2] sm:$0xff]  ;;  %v3181_v10 = vperm.slane %v1660_v56, 0  ;;  %v3183_v11 = vperm.slane %v1660_v56, 1  ;;  %v1631_v37 = vld [vmem:[#allocation2 + $0x18] sm:$0xff]  ;;  %v1632_v51 = vld [vmem:[#allocation2 + $0x50] sm:$0xff] }
 0x560   : > { %v1633_v8 = vld [vmem:[#allocation2 + $0x68] sm:$0xff]  ;;  %v1634_v25 = vld [vmem:[#allocation2 + $0x30] sm:$0xff]  ;;  %v1636_v1 = vld [vmem:[#allocation2 + $0x80] sm:$0xff] }
 0x561   : > { %v1666_v42 = vadd.f32 %v3181_v10, %v1628_v45  ;;  %v1667_v41 = vadd.f32 %v3183_v11, %v1629_v39  ;;  %v1668_v18 = vadd.f32 %v3181_v10, %v1630_v38  ;;  %v1669_v9 = vadd.f32 %v3183_v11, %v1631_v37  ;;  %v1635_v36 = vld [vmem:[#allocation2 + $0x48] sm:$0xff]  ;;  %v1639_v16 = vld [vmem:[#allocation2 + $0xb8] sm:$0xff]  ;;  %v1640_v5 = vld [vmem:[#allocation2 + $0x60] sm:$0xff] }
 0x562   : > { %v1670_v3 = vadd.f32 %v3181_v10, %v1632_v51  ;;  %v1671_v13 = vadd.f32 %v3183_v11, %v1633_v8  ;;  %v1672_v46 = vadd.f32 %v3181_v10, %v1634_v25  ;;  %v1637_v61 = vld [vmem:[#allocation2 + $0x88] sm:$0xff]  ;;  %v1673_v34 = vadd.f32 %v3183_v11, %v1635_v36  ;;  %v1641_v17 = vld [vmem:[#allocation2 + $0xf0] sm:$0xff]  ;;  %v1643_v57 = vld [vmem:[#allocation2 + $0x78] sm:$0xff] }
 0x563   : > { %1698 = vst [vmem:[%s2567_s15] sm:$0xff] %v1666_v42  ;;  %v1638_v2 = vld [vmem:[#allocation2 + $0xe8] sm:$0xff]  ;;  %v1674_v62 = vadd.f32 %v3181_v10, %v1636_v1  ;;  %v1675_v59 = vadd.f32 %v3183_v11, %v1637_v61  ;;  %v1677_v50 = vadd.f32 %v3183_v11, %v1639_v16  ;;  %v1678_v20 = vadd.f32 %v3181_v10, %v1640_v5  ;;  %v1644_v60 = vld [vmem:[#allocation2 + $0x38] sm:$0xff]  ;;  %v1646_v12 = vld [vmem:[#allocation2 + $0x40] sm:$0xff] }
 0x564   : > { %1699 = vst [vmem:[%s2567_s15 + $0x8] sm:$0xff] %v1667_v41  ;;  %v1676_v24 = vadd.f32 %v3181_v10, %v1638_v2  ;;  %v1642_v44 = vld [vmem:[#allocation2 + $0x8] sm:$0xff]  ;;  %v1679_v55 = vadd.f32 %v3183_v11, %v1641_v17  ;;  %v1645_v6 = vld [vmem:[#allocation2 + $0x58] sm:$0xff]  ;;  %v1681_v27 = vadd.f32 %v3183_v11, %v1643_v57  ;;  %v1682_v19 = vadd.f32 %v3181_v10, %v1644_v60  ;;  %v1648_v58 = vld [vmem:[#allocation2 + $0xe0] sm:$0xff] }
 0x565   : > { %1700 = vst [vmem:[%s2567_s15 + $0x10] sm:$0xff] %v1668_v18  ;;  %v1680_v26 = vadd.f32 %v3181_v10, %v1642_v44  ;;  %v1647_v14 = vld [vmem:[#allocation2 + $0xc8] sm:$0xff]  ;;  %v1683_v31 = vadd.f32 %v3183_v11, %v1645_v6  ;;  %v1684_v29 = vadd.f32 %v3181_v10, %v1646_v12  ;;  %v1649_v28 = vld [vmem:[#allocation2 + $0x90] sm:$0xff]  ;;  %v1686_v7 = vadd.f32 %v3181_v10, %v1648_v58  ;;  %v1651_v32 = vld [vmem:[#allocation2 + $0xc0] sm:$0xff] }
 0x566   : > { %1701 = vst [vmem:[%s2567_s15 + $0x18] sm:$0xff] %v1669_v9  ;;  %v1685_v30 = vadd.f32 %v3183_v11, %v1647_v14  ;;  %v1650_v49 = vld [vmem:[#allocation2 + $0x70] sm:$0xff]  ;;  %v1687_v33 = vadd.f32 %v3183_v11, %v1649_v28  ;;  %v1652_v43 = vld [vmem:[#allocation2 + $0xa8] sm:$0xff]  ;;  %v1689_v47 = vadd.f32 %v3183_v11, %v1651_v32  ;;  %v1656_v63 = vld [vmem:[#allocation2 + $0xa0] sm:$0xff] }
 0x567   : > { %1702 = vst [vmem:[%s2567_s15 + $0x20] sm:$0xff] %v1670_v3  ;;  %v1688_v53 = vadd.f32 %v3181_v10, %v1650_v49  ;;  %v1653_v54 = vld [vmem:[#allocation2 + $0xd0] sm:$0xff]  ;;  %v1690_v52 = vadd.f32 %v3181_v10, %v1652_v43  ;;  %v1655_v22 = vld [vmem:[#allocation2 + $0x28] sm:$0xff]  ;;  %v1657_v0 = vld [vmem:[#allocation2 + $0xf8] sm:$0xff]  ;;  %v1694_v21 = vadd.f32 %v3181_v10, %v1656_v63 }
 0x568   : > { %1703 = vst [vmem:[%s2567_s15 + $0x28] sm:$0xff] %v1671_v13  ;;  %v1654_v40 = vld [vmem:[#allocation2 + $0x10] sm:$0xff]  ;;  %v1691_v35 = vadd.f32 %v3183_v11, %v1653_v54  ;;  %v1693_v23 = vadd.f32 %v3183_v11, %v1655_v22  ;;  %v1658_v48 = vld [vmem:[#allocation2 + $0x20] sm:$0xff]  ;;  %v1659_v15 = vld [vmem:[#allocation2 + $0x98] sm:$0xff]  ;;  %v1695_v45 = vadd.f32 %v3183_v11, %v1657_v0 }
 0x569   : > { %1704 = vst [vmem:[%s2567_s15 + $0x30] sm:$0xff] %v1672_v46  ;;  %v1692_v4 = vadd.f32 %v3181_v10, %v1654_v40  ;;  %v1696_v56 = vadd.f32 %v3181_v10, %v1658_v48  ;;  %v1697_v39 = vadd.f32 %v3183_v11, %v1659_v15 }
 0x56a   : > { %1705 = vst [vmem:[%s2567_s15 + $0x38] sm:$0xff] %v1673_v34 }
 0x56b   : > { %1706 = vst [vmem:[%s2567_s15 + $0x40] sm:$0xff] %v1674_v62 }
 0x56c   : > { %1707 = vst [vmem:[%s2567_s15 + $0x48] sm:$0xff] %v1675_v59 }
 0x56d   : > { %1708 = vst [vmem:[%s2567_s15 + $0x50] sm:$0xff] %v1676_v24 }
 0x56e   : > { %1709 = vst [vmem:[%s2567_s15 + $0x58] sm:$0xff] %v1677_v50 }
 0x56f   : > { %1710 = vst [vmem:[%s2567_s15 + $0x60] sm:$0xff] %v1678_v20 }
 0x570   : > { %1711 = vst [vmem:[%s2567_s15 + $0x68] sm:$0xff] %v1679_v55 }
 0x571   : > { %1712 = vst [vmem:[%s2567_s15 + $0x70] sm:$0xff] %v1680_v26 }
 0x572   : > { %1713 = vst [vmem:[%s2567_s15 + $0x78] sm:$0xff] %v1681_v27 }
 0x573   : > { %1714 = vst [vmem:[%s2567_s15 + $0x80] sm:$0xff] %v1682_v19 }
 0x574   : > { %1715 = vst [vmem:[%s2567_s15 + $0x88] sm:$0xff] %v1683_v31 }
 0x575   : > { %1716 = vst [vmem:[%s2567_s15 + $0x90] sm:$0xff] %v1684_v29 }
 0x576   : > { %1717 = vst [vmem:[%s2567_s15 + $0x98] sm:$0xff] %v1685_v30 }
 0x577   : > { %1718 = vst [vmem:[%s2567_s15 + $0xa0] sm:$0xff] %v1686_v7 }
 0x578   : > { %1719 = vst [vmem:[%s2567_s15 + $0xa8] sm:$0xff] %v1687_v33 }
 0x579   : > { %1720 = vst [vmem:[%s2567_s15 + $0xb0] sm:$0xff] %v1688_v53 }
 0x57a   : > { %1721 = vst [vmem:[%s2567_s15 + $0xb8] sm:$0xff] %v1689_v47 }
 0x57b   : > { %1722 = vst [vmem:[%s2567_s15 + $0xc0] sm:$0xff] %v1690_v52 }
 0x57c   : > { %1723 = vst [vmem:[%s2567_s15 + $0xc8] sm:$0xff] %v1691_v35 }
 0x57d   : > { %1724 = vst [vmem:[%s2567_s15 + $0xd0] sm:$0xff] %v1692_v4 }
 0x57e   : > { %1725 = vst [vmem:[%s2567_s15 + $0xd8] sm:$0xff] %v1693_v23 }
 0x57f   : > { %1726 = vst [vmem:[%s2567_s15 + $0xe0] sm:$0xff] %v1694_v21 }
 0x580   : > { %1727 = vst [vmem:[%s2567_s15 + $0xe8] sm:$0xff] %v1695_v45 }
 0x581   : > { %1728 = vst [vmem:[%s2567_s15 + $0xf0] sm:$0xff] %v1696_v56 }
 0x582   : > { %1729 = vst [vmem:[%s2567_s15 + $0xf8] sm:$0xff] %v1697_v39 }
 0x583 PF: > { %s3397_s21 = sld [smem:[#allocation15_spill]]  ;;  %s1743_s6 = sshll.u32 %s2567_s15, 4  ;;  %s1744_s6 = int_to_ptr.vmem [resolvable:$true] %s1743_s6 }
 0x584   : > { %s3399_s1 = sld [smem:[#allocation47_spill]]  ;;  %s1731_s3 = scalar_lea.sflag [#allocation5], %s2547_s14 }
 0x589   : > { %s1900_s5 = sshll.u32 %s3397_s21, 8 }
 0x58a   : > { %s1742_s22 = scalar_lea.hbm %s3399_s1, %s1900_s5  ;;  %s2229_s8 = scalar_lea.hbm %s3399_s1, 512 }
 0x58b   : > { %s1745_s13 = sshll.u32 %s1742_s22, 4  ;;  %s1746_s13 = int_to_ptr.hbm [resolvable:$true] %s1745_s13 }
 0x58c   : > { %s2223_s24 = sshra.s32 %s1746_s13, 4  ;;  %s2224_s24 = int_to_ptr.hbm [resolvable:$true] %s2223_s24 }
 0x58d   : > { %s2225_s18 = scalar_lea.hbm %s2224_s24, 256  ;;  %p2230_p4 = scmp.lt.s32.totalorder %s2224_s24, %s3399_s1 }
 0x58e   : > { %p2226_p10 = scmp.ne.s32.totalorder %s2224_s24, %s2225_s18  ;;  %p2231_p6 = scmp.lt.s32.totalorder %s2229_s8, %s2225_s18 }
 0x590   : > { %p2227_p12 = pnand %p2226_p10, %p2512_p0  ;;  %p2232_p8 = por %p2231_p6, %p2230_p4 }
 0x592   : > { %p2228_p2 = pneg %p2227_p12 }
 0x594   : > { %p2233_p1 = pnand %p2232_p8, %p2228_p2 }
 0x596   : > { %2236 = shalt.err (!%p2233_p1)
}
 0x597   : > { %s2343_s14 = smov 256   ;;  %s2344_s9 = smov 16  }
 0x598   : > { %1941 = dma.vmem_to_hbm [thread:$0]  (%p2512_p0), %s1744_s6, 4096, %s1746_s13, %s1731_s3, %s2343_s14, %s2343_s14, %s2344_s9  }
 0x599 PF: > { %s3400_s11 = sld [smem:[#allocation13_spill]]  ;;  %p1958_p9 = scmp.ge.s32.totalorder %s2335_s25, 2 }
 0x59b   : > { %p1954_p13 = pnand %p1958_p9, %p2524_p3 }
 0x59d   : > { %p1955_p11 = pneg %p1954_p13 }
 0x59f   : > { %s1760_s12 = sand.u32 1, %s3400_s11  }
 0x5a0   : > { %s1761_s27 = scalar_lea.sflag [#allocation5], %s1760_s12 }
 0x5a1   : > { %2290 = dma.done.wait (%p1955_p11), %s1761_s27, 4096  }
 0x5a2   : > { %2292 = vsyncadd (%p1955_p11), %s1761_s27, 4294963200  ;;  %s23_s25 = sadd.s32 1, %s2335_s25   ;;  %s3402_s28 = sld [smem:[#allocation18_spill]] }
 0x5a3   : > { %p20_p5 = scmp.ge.s32.totalorder %s23_s25, 6   ;;  %s3403_s21 = sld [smem:[#allocation14_spill]] }
 0x5a4   : > { %s3404_s20 = sld [smem:[#allocation21_spill]]  ;;  %s3408_s15 = smov %s2299_s16 }
 0x5a5   : > { %s3405_s22 = sld [smem:[#allocation16_spill]]  ;;  %s3409_s16 = smov %s2303_s17 }
 0x5a6   : > { %s3406_s30 = sld [smem:[#allocation17_spill]]  ;;  %s3411_s18 = smov %s2311_s19 }
 0x5a7   : > { %s3407_s24 = sld [smem:[#allocation19_spill]] }
 0x5a8   : > { %s3410_s17 = smov %s3402_s28  ;;  %22 = sbr.rel (!%p20_p5) target bundleno = 15 (0xf), region = 113 }
 0x5a9   : > { %s3412_s19 = smov %s3403_s21  ;;  %s3413_s21 = smov %s2327_s23 }
 0x5ac   : > { %s3414_s23 = smov %s3406_s30 }
 0x5ad   :  { %1767 = vsyncpa [#allocation4], 1 }
 0x5ae   :  { %1769 = vsyncpa [#allocation4 + $0x1], 1 }
 0x5af   :  { %1770 = vsyncpa [#allocation7], 1 }
 0x5b0   :  { %1772 = vsyncpa [#allocation7 + $0x1], 1 }
 0x5b1   :  { %1773 = vsyncpa [#allocation5], 1 }
 0x5b2   :  { %1775 = vsyncpa [#allocation5 + $0x1], 1 }

</bundles_post_ra>
